<compile_context>
chip_gen: v7x
topology: tpu7x:2x2x1
jax: 0.10.0
libtpu: 0.0.40
codegen_flags: <defaults>
</compile_context>

<pallas_src>
import functools

import jax
import jax.numpy as jnp
from jax.experimental import pallas as pl
from jax.experimental.pallas import tpu as pltpu

DROPOUT_P = 0.2
N_EMBED = 384


def _round_up(a, b):
    return ((a + b - 1) // b) * b


def _largest_h_tile(H, target):
    """Largest divisor of H that is a multiple of 128 and <= target (MXU-friendly tiles,
    bounded weight VMEM).  Falls back to H if no such divisor exists."""
    best = 0
    cand = 128
    while cand <= min(H, target):
        if H % cand == 0:
            best = cand
        cand += 128
    if best == 0:
        # TODO(synk): pad H to a multiple of 128 instead of making the full weights resident.
        return H
    return best


def _apply_dropout(y, seed_ref, row_offset):
    """Inverted dropout: keep if hash(global_row, col, seed) >= p * 2^32; scale by 1/(1-p)."""
    shape = y.shape
    row = (jax.lax.broadcasted_iota(jnp.int32, shape, 0) + row_offset).astype(jnp.uint32)
    col = jax.lax.broadcasted_iota(jnp.int32, shape, 1).astype(jnp.uint32)
    s = seed_ref[0].astype(jnp.uint32)
    bits = (row * jnp.uint32(0x9E3779B1)
            + col * jnp.uint32(0x85EBCA77)
            + s * jnp.uint32(0xC2B2AE3D))
    # lowbias32-style finalizer for avalanche.
    bits = bits ^ (bits >> 16)
    bits = bits * jnp.uint32(0x7FEB352D)
    bits = bits ^ (bits >> 15)
    bits = bits * jnp.uint32(0x846CA68B)
    bits = bits ^ (bits >> 16)
    threshold = jnp.uint32(int(DROPOUT_P * (2 ** 32)))  # keep prob = 1 - p
    keep = bits >= threshold
    return jnp.where(keep, y * jnp.float32(1.0 / (1.0 - DROPOUT_P)), jnp.float32(0.0))


def _ffn_kernel_resident(seed_ref, x_ref, w1_ref, b1_ref, w2_ref, b2_ref, o_ref,
                         *, training, tm):
    """n_h == 1 fast path: weights fully resident, no accumulator scratch."""
    # program_id at top level only (interpreter-safe; never inside pl.when).
    row0 = pl.program_id(0) * tm
    h = jnp.dot(x_ref[...], w1_ref[...], preferred_element_type=jnp.float32)
    # Fused bias + ReLU + cast back to the MXU compute dtype.
    h = jnp.maximum(h + b1_ref[...], 0.0).astype(w2_ref.dtype)
    y = jnp.dot(h, w2_ref[...], preferred_element_type=jnp.float32) + b2_ref[...]
    if training:
        y = _apply_dropout(y, seed_ref, row0)
    o_ref[...] = y.astype(o_ref.dtype)


def _ffn_kernel_tiled(seed_ref, x_ref, w1_ref, b1_ref, w2_ref, b2_ref, o_ref, acc_ref,
                      *, training, tm):
    """H streamed over the grid's reduction axis with an f32 VMEM accumulator."""
    h_idx = pl.program_id(1)
    last_h = pl.num_programs(1) - 1
    row0 = pl.program_id(0) * tm  # top level; captured (not re-bound) inside pl.when bodies

    h = jnp.dot(x_ref[...], w1_ref[...], preferred_element_type=jnp.float32)
    h = jnp.maximum(h + b1_ref[...], 0.0).astype(w2_ref.dtype)
    partial = jnp.dot(h, w2_ref[...], preferred_element_type=jnp.float32)

    @pl.when(h_idx == 0)
    def _first():
        acc_ref[...] = partial          # direct store: no zero-init + read-modify-write pass

    @pl.when(h_idx > 0)
    def _rest():
        acc_ref[...] += partial

    @pl.when(h_idx == last_h)
    def _finalize():
        y = acc_ref[...] + b2_ref[...]
        if training:
            y = _apply_dropout(y, seed_ref, row0)
        o_ref[...] = y.astype(o_ref.dtype)


def feed_forward(x, w1, b1, w2, b2, *, seed=0, training=False, tm=512, th=None,
                 compute_dtype=jnp.bfloat16, vmem_limit_bytes=None):
    """Fused Linear(D->4D) -> ReLU -> Linear(4D->D) -> Dropout(p=0.2).

    x: (B, T, D); w1: (D, H); b1: (1, H); w2: (H, D); b2: (1, D).
    Weights are stored pre-transposed (in_features, out_features) vs. torch's (out, in).
    Matmul operands run in `compute_dtype` (bf16 default); accumulation, biases and the
    ReLU stay in f32; output keeps the input dtype.
    """
    orig_dtype = x.dtype
    B, T, D = x.shape
    H = w1.shape[1]
    assert w1.shape == (D, H) and b1.shape == (1, H)
    assert w2.shape == (H, D) and b2.shape == (1, D)

    cdtype = jnp.dtype(compute_dtype) if compute_dtype is not None else jnp.dtype(orig_dtype)
    M = B * T
    xc = x.astype(cdtype).reshape(M, D)
    w1c = w1.astype(cdtype)
    w2c = w2.astype(cdtype)
    b1f = b1.astype(jnp.float32)
    b2f = b2.astype(jnp.float32)

    # Row tile: big enough to feed the MXU, but keep >= 2 M-tiles so the "parallel" axis
    # can shard across both v7x TensorCores even for small M.
    half_m = _round_up(max(1, (M + 1) // 2), 8)
    tm_eff = max(8, min(tm, half_m))

    # Hidden-dim tile: weights fully resident when their (double-buffered) tiles fit a
    # conservative budget; otherwise stream H in MXU-friendly chunks.
    if th is None:
        resident_bytes = 2 * (2 * D * H * cdtype.itemsize)   # (W1 + W2) x 2 buffers
        th = H if resident_bytes <= (16 << 20) else _largest_h_tile(H, 512)
    th = min(th, H)
    if H % th != 0:
        th = _largest_h_tile(H, th)
    n_h = H // th

    def footprint(tm_v):
        x_blk = 2 * tm_v * D * cdtype.itemsize
        o_blk = 2 * tm_v * D * jnp.dtype(orig_dtype).itemsize
        w_blk = 2 * (D * th + th * D) * cdtype.itemsize
        b_blk = 2 * (th + D) * 4
        acc = tm_v * D * 4 if n_h > 1 else 0
        hidden = tm_v * th * (4 + cdtype.itemsize)   # f32 matmul result + compute-dtype copy
        return x_blk + o_blk + w_blk + b_blk + acc + hidden

    # Keep the resident set v7x-safe (64 MiB physical VMEM per TensorCore).
    while tm_eff > 128 and footprint(tm_eff) > (40 << 20):
        tm_eff = max(128, _round_up(tm_eff // 2, 8))

    M_pad = _round_up(M, tm_eff)
    if M_pad != M:
        xc = jnp.pad(xc, ((0, M_pad - M), (0, 0)))

    if vmem_limit_bytes is None:
        vmem_limit_bytes = min(max(int(footprint(tm_eff) * 1.25) + (4 << 20), 32 << 20),
                               64 << 20)

    seed_arr = jnp.asarray([seed], dtype=jnp.int32)
    out_shape = jax.ShapeDtypeStruct((M_pad, D), orig_dtype)
    flops = 4 * M_pad * D * H  # two matmuls, 2*M*D*H each
    bytes_accessed = (M_pad * D * cdtype.itemsize
                      + 2 * D * H * cdtype.itemsize
                      + (H + D) * 4
                      + M_pad * D * jnp.dtype(orig_dtype).itemsize)
    cost = pl.CostEstimate(flops=flops, transcendentals=0, bytes_accessed=bytes_accessed)

    if n_h == 1:
        kernel = functools.partial(_ffn_kernel_resident, training=training, tm=tm_eff)
        grid_spec = pltpu.PrefetchScalarGridSpec(
            num_scalar_prefetch=1,                       # dropout seed lives in SMEM
            grid=(M_pad // tm_eff,),
            in_specs=[
                pl.BlockSpec((tm_eff, D), lambda i, seed: (i, 0)),  # x rows
                pl.BlockSpec((D, H), lambda i, seed: (0, 0)),       # W1 (resident)
                pl.BlockSpec((1, H), lambda i, seed: (0, 0)),       # b1
                pl.BlockSpec((H, D), lambda i, seed: (0, 0)),       # W2 (resident)
                pl.BlockSpec((1, D), lambda i, seed: (0, 0)),       # b2
            ],
            out_specs=pl.BlockSpec((tm_eff, D), lambda i, seed: (i, 0)),
        )
        dim_sem = ("parallel",)
    else:
        kernel = functools.partial(_ffn_kernel_tiled, training=training, tm=tm_eff)
        grid_spec = pltpu.PrefetchScalarGridSpec(
            num_scalar_prefetch=1,
            grid=(M_pad // tm_eff, n_h),
            in_specs=[
                pl.BlockSpec((tm_eff, D), lambda i, h, seed: (i, 0)),  # x rows
                pl.BlockSpec((D, th), lambda i, h, seed: (0, h)),      # W1 tile
                pl.BlockSpec((1, th), lambda i, h, seed: (0, h)),      # b1 tile
                pl.BlockSpec((th, D), lambda i, h, seed: (h, 0)),      # W2 tile
                pl.BlockSpec((1, D), lambda i, h, seed: (0, 0)),       # b2
            ],
            out_specs=pl.BlockSpec((tm_eff, D), lambda i, h, seed: (i, 0)),
            scratch_shapes=[pltpu.VMEM((tm_eff, D), jnp.float32)],     # f32 accumulator
        )
        dim_sem = ("parallel", "arbitrary")

    out = pl.pallas_call(
        kernel,
        out_shape=out_shape,
        grid_spec=grid_spec,
        compiler_params=pltpu.CompilerParams(
            dimension_semantics=dim_sem,
            vmem_limit_bytes=vmem_limit_bytes),
        cost_estimate=cost,
    )(seed_arr, xc, w1c, b1f, w2c, b2f)

    return out[:M].reshape(B, T, D)


if __name__ == "__main__":
    # Shapes consistent with the module: n_embed = 384, hidden = 4 * n_embed, small batch/seq.
    B, T, D = 2, 8, N_EMBED
    H = 4 * D

    key = jax.random.PRNGKey(0)
    kx, k1, k2, k3, k4 = jax.random.split(key, 5)
    x = jax.random.normal(kx, (B, T, D), dtype=jnp.float32)
    # nn.Linear weights are (out, in) in torch; stored pre-transposed (in, out) here.
    w1 = jax.random.normal(k1, (D, H), dtype=jnp.float32) * 0.02
    b1 = jax.random.normal(k2, (1, H), dtype=jnp.float32) * 0.02
    w2 = jax.random.normal(k3, (H, D), dtype=jnp.float32) * 0.02
    b2 = jax.random.normal(k4, (1, D), dtype=jnp.float32) * 0.02

    y_ref = (jnp.maximum(x.reshape(-1, D) @ w1 + b1, 0.0) @ w2 + b2).reshape(B, T, D)

    # Eval, default bf16 MXU path (f32 accumulation, f32 output), looser tolerance.
    y_bf16 = feed_forward(x, w1, b1, w2, b2, training=False)
    jax.block_until_ready(y_bf16)
    assert jnp.allclose(y_bf16, y_ref, atol=3e-2, rtol=3e-2), "bf16 mismatch vs reference"

    # Eval, full f32 matmul path, tight tolerance.
    y_f32 = feed_forward(x, w1, b1, w2, b2, training=False, compute_dtype=jnp.float32)
    jax.block_until_ready(y_f32)
    assert jnp.allclose(y_f32, y_ref, atol=1e-3, rtol=1e-3), "f32 mismatch vs reference"

    # Eval, explicit H-reduction grid axis (exercises the accumulator/tiled kernel).
    y_tiled = feed_forward(x, w1, b1, w2, b2, training=False, th=512,
                           compute_dtype=jnp.float32)
    jax.block_until_ready(y_tiled)
    assert jnp.allclose(y_tiled, y_ref, atol=1e-3, rtol=1e-3), "H-tiled mismatch vs reference"

    # Training mode: exercises in-kernel inverted dropout (integer-threshold keep test).
    y_train = feed_forward(x, w1, b1, w2, b2, seed=1234, training=True)
    jax.block_until_ready(y_train)
    zero_frac = float(jnp.mean(y_train == 0.0))
    assert 0.12 < zero_frac < 0.28, f"dropout zero fraction {zero_frac} not near p=0.2"

    print("KERNEL_OK")
</pallas_src>

<mosaic_0001>
module attributes {stable_mosaic.version = 11 : i64} {
  func.func @_ffn_kernel_resident(%arg0: i32, %arg1: memref<1xi32, #tpu.memory_space<smem>>, %arg2: memref<8x384xbf16, #tpu.memory_space<vmem>>, %arg3: memref<384x1536xbf16, #tpu.memory_space<vmem>>, %arg4: memref<1x1536xf32, #tpu.memory_space<vmem>>, %arg5: memref<1536x384xbf16, #tpu.memory_space<vmem>>, %arg6: memref<1x384xf32, #tpu.memory_space<vmem>>, %arg7: memref<8x384xf32, #tpu.memory_space<vmem>>) attributes {dimension_semantics = [#tpu.dimension_semantics<parallel>], iteration_bounds = array<i64: 2>, scalar_prefetch = 1 : i64, scratch_operands = 0 : i64, tpu.core_type = #tpu.core_type<tc>, window_params = [{transform_indices = @transform_0, window_bounds = array<i64: 8, 384>}, {pipeline_mode = #tpu.pipeline_mode<synchronous>, transform_indices = @transform_1, window_bounds = array<i64: 384, 1536>}, {pipeline_mode = #tpu.pipeline_mode<synchronous>, transform_indices = @transform_2, window_bounds = array<i64: 1, 1536>}, {pipeline_mode = #tpu.pipeline_mode<synchronous>, transform_indices = @transform_3, window_bounds = array<i64: 1536, 384>}, {pipeline_mode = #tpu.pipeline_mode<synchronous>, transform_indices = @transform_4, window_bounds = array<i64: 1, 384>}, {transform_indices = @transform_5, window_bounds = array<i64: 8, 384>}]} {
    %c0 = arith.constant 0 : index
    %c0_0 = arith.constant 0 : index
    %0 = vector.load %arg2[%c0, %c0_0] : memref<8x384xbf16, #tpu.memory_space<vmem>>, vector<8x384xbf16>
    %c0_1 = arith.constant 0 : index
    %c0_2 = arith.constant 0 : index
    %1 = vector.load %arg3[%c0_1, %c0_2] : memref<384x1536xbf16, #tpu.memory_space<vmem>>, vector<384x1536xbf16>
    %cst = arith.constant dense<0.000000e+00> : vector<8x1536xf32>
    %2 = tpu.matmul %0, %1, %cst {dimension_numbers = #tpu.dot_dimension_numbers<[1], [0], [0], [1], [0, 0, 1, 1], [], []>} : vector<8x384xbf16>, vector<384x1536xbf16>, vector<8x1536xf32> -> vector<8x1536xf32>
    %c0_3 = arith.constant 0 : index
    %c0_4 = arith.constant 0 : index
    %3 = vector.load %arg4[%c0_3, %c0_4] : memref<1x1536xf32, #tpu.memory_space<vmem>>, vector<1x1536xf32>
    %4 = vector.broadcast %3 : vector<1x1536xf32> to vector<8x1536xf32>
    %5 = arith.addf %2, %4 : vector<8x1536xf32>
    %cst_5 = arith.constant 0.000000e+00 : f32
    %6 = vector.broadcast %cst_5 : f32 to vector<8x1536xf32>
    %7 = arith.maximumf %5, %6 : vector<8x1536xf32>
    %8 = arith.truncf %7 : vector<8x1536xf32> to vector<8x1536xbf16>
    %c0_6 = arith.constant 0 : index
    %c0_7 = arith.constant 0 : index
    %9 = vector.load %arg5[%c0_6, %c0_7] : memref<1536x384xbf16, #tpu.memory_space<vmem>>, vector<1536x384xbf16>
    %cst_8 = arith.constant dense<0.000000e+00> : vector<8x384xf32>
    %10 = tpu.matmul %8, %9, %cst_8 {dimension_numbers = #tpu.dot_dimension_numbers<[1], [0], [0], [1], [0, 0, 1, 1], [], []>} : vector<8x1536xbf16>, vector<1536x384xbf16>, vector<8x384xf32> -> vector<8x384xf32>
    %c0_9 = arith.constant 0 : index
    %c0_10 = arith.constant 0 : index
    %11 = vector.load %arg6[%c0_9, %c0_10] : memref<1x384xf32, #tpu.memory_space<vmem>>, vector<1x384xf32>
    %12 = vector.broadcast %11 : vector<1x384xf32> to vector<8x384xf32>
    %13 = arith.addf %10, %12 : vector<8x384xf32>
    %c0_11 = arith.constant 0 : index
    %c0_12 = arith.constant 0 : index
    %14 = vector.load %arg7[%c0_11, %c0_12] : memref<8x384xf32, #tpu.memory_space<vmem>>, vector<8x384xf32>
    tpu.vector_store %arg7[%c0_11, %c0_12], %13 {strides = array<i32>} : memref<8x384xf32, #tpu.memory_space<vmem>>, vector<8x384xf32>,
    return
  }
  func.func @transform_0(%arg0: i32, %arg1: memref<1xi32, #tpu.memory_space<smem>>) -> (i32, i32) {
    %c0_i32 = arith.constant 0 : i32
    %c0_i32_0 = arith.constant 0 : i32
    return %arg0, %c0_i32 : i32, i32
  }
  func.func @transform_1(%arg0: i32, %arg1: memref<1xi32, #tpu.memory_space<smem>>) -> (i32, i32) {
    %c0_i32 = arith.constant 0 : i32
    %c0_i32_0 = arith.constant 0 : i32
    %c0_i32_1 = arith.constant 0 : i32
    return %c0_i32, %c0_i32_0 : i32, i32
  }
  func.func @transform_2(%arg0: i32, %arg1: memref<1xi32, #tpu.memory_space<smem>>) -> (i32, i32) {
    %c0_i32 = arith.constant 0 : i32
    %c0_i32_0 = arith.constant 0 : i32
    %c0_i32_1 = arith.constant 0 : i32
    return %c0_i32, %c0_i32_0 : i32, i32
  }
  func.func @transform_3(%arg0: i32, %arg1: memref<1xi32, #tpu.memory_space<smem>>) -> (i32, i32) {
    %c0_i32 = arith.constant 0 : i32
    %c0_i32_0 = arith.constant 0 : i32
    %c0_i32_1 = arith.constant 0 : i32
    return %c0_i32, %c0_i32_0 : i32, i32
  }
  func.func @transform_4(%arg0: i32, %arg1: memref<1xi32, #tpu.memory_space<smem>>) -> (i32, i32) {
    %c0_i32 = arith.constant 0 : i32
    %c0_i32_0 = arith.constant 0 : i32
    %c0_i32_1 = arith.constant 0 : i32
    return %c0_i32, %c0_i32_0 : i32, i32
  }
  func.func @transform_5(%arg0: i32, %arg1: memref<1xi32, #tpu.memory_space<smem>>) -> (i32, i32) {
    %c0_i32 = arith.constant 0 : i32
    %c0_i32_0 = arith.constant 0 : i32
    return %arg0, %c0_i32 : i32, i32
  }
}

</mosaic_0001>

<bundles_post_ra>
// kernel: tpu_custom_call.1
= control target key start
LH: loop header
LB: loop body
LE: loop exit
PB: predicated region body
PF: predicated region fallthrough
CT: control target
= control target key end

     0   :  { %12 = vsyncpa [#allocation5], 0  ;;  %s7536_s0 = inlined_call_operand.<no memory space> [shape: s32[1], index: 0, kind: input, shape index: {}]   ;;  %s7537_s1 = inlined_call_operand.hbm [shape: bf16[16,384], index: 1, kind: input, shape index: {}]   ;;  %s7538_s2 = inlined_call_operand.hbm [shape: bf16[384,1536], index: 2, kind: input, shape index: {}]   ;;  %s7539_s3 = inlined_call_operand.hbm [shape: f32[1,1536], index: 3, kind: input, shape index: {}]   ;;  %s7540_s4 = inlined_call_operand.hbm [shape: bf16[1536,384], index: 4, kind: input, shape index: {}]   ;;  %s7541_s5 = inlined_call_operand.hbm [shape: f32[1,384], index: 5, kind: input, shape index: {}]   ;;  %s7542_s6 = inlined_call_operand.hbm [shape: f32[16,384], index: 6, kind: output, shape index: {}]  }
   0x1   :  { %14 = vsyncpa [#allocation5 + $0x1], 0 }
   0x2   :  { %15 = vsyncpa [#allocation8], 0 }
   0x3   :  { %16 = vsyncpa [#allocation11], 0 }
   0x4   :  { %17 = vsyncpa [#allocation6], 0 }
   0x5   :  { %19 = vsyncpa [#allocation6 + $0x1], 0  ;;  %s7135_s0 = smov 0   ;;  %s7137_s21 = smov 0  }
   0x6   :  { %s7139_s22 = smov 0   ;;  %s7141_s23 = smov 0  }
   0x7 LB: > { %s7089_s24 = smov [#allocation7]   ;;  %s7156_s26 = sadd.s32 4294967295, %s7087_s23   ;;  %s7087_s23 = sphi %s7141_s23, %s7565_s23   ;;  %s7083_s22 = sphi %s7139_s22, %s7564_s22   ;;  %s7079_s21 = sphi %s7137_s21, %s7563_s21   ;;  %s7075_s0 = sphi %s7135_s0, %s7562_s0  }
   0x8   : > { %s178_s25 = sshll.u32 %s7089_s24, 4  ;;  %p5169_p0 = scmp.ge.s32.totalorder %s7087_s23, 1  ;;  %s7161_s25 = int_to_ptr.vmem [resolvable:$true] %s178_s25 }
   0x9   : > { %p7543_p1 = scmp.eq.s32.totalorder %s7156_s26, 0  ;;  %p166_p2 = scmp.lt.s32.totalorder %s7087_s23, 3 }
   0xa   : > { %s7090_s28 = smov [#allocation10]   ;;  %s7091_s7 = smov [#allocation9]  }
   0xb   : > { %p7163_p3 = pnand %p5169_p0, %p166_p2  ;;  %s202_s29 = sshll.u32 %s7090_s28, 4  ;;  %s7176_s29 = int_to_ptr.vmem [resolvable:$true] %s202_s29 }
   0xc   : > { %s7178_s8 = sshll.u32 %s7091_s7, 4  ;;  %s6871_s11 = scalar_lea.hbm %s7538_s2, 36864  ;;  %s193_s8 = int_to_ptr.vmem [resolvable:$true] %s7178_s8 }
   0xd   : > { %s7546_s27 = scalar_select %p7163_p3, 1, 0 }
   0xe   : > { %p5978_p5 = pneg %p7163_p3  ;;  %p6872_p7 = scmp.ne.s32.totalorder %s7538_s2, %s6871_s11 }
   0xf   : > { %p6878_p11 = scmp.lt.u32.totalorder %s6871_s11, %s7538_s2 }
  0x10   : > { %p7172_p6 = pnand %p5978_p5, %p7543_p1 }
  0x12   : > { %p7188_p8 = pneg %p7172_p6 }
  0x14   : > { %p6874_p9 = pnand %p7188_p8, %p6872_p7 }
  0x16   : > { %p6875_p10 = pneg %p6874_p9 }
  0x18   : > { %p6880_p12 = pnand %p6878_p11, %p6875_p10 }
  0x1a   : > { %6883 = shalt.err (!%p6880_p12)
}
  0x1b   : > { %s6884_s17 = scalar_lea.vmem %s7161_s25, 36864  ;;  %p6892_p5 = scmp.lt.s32.totalorder %s7161_s25, %s7161_s25 }
  0x1c   : > { %p6885_p13 = scmp.ne.s32.totalorder %s7161_s25, %s6884_s17  ;;  %p6893_p4 = scmp.lt.s32.totalorder %s6884_s17, %s6884_s17 }
  0x1e   : > { %p6887_p0 = pnand %p6885_p13, %p7188_p8  ;;  %p6894_p7 = por %p6893_p4, %p6892_p5 }
  0x20   : > { %p6888_p2 = pneg %p6887_p0 }
  0x22   : > { %p6895_p9 = pnand %p6894_p7, %p6888_p2 }
  0x24   : > { %6898 = shalt.err (!%p6895_p9)
}
  0x25   : > { %s7092_s18 = smov 768   ;;  %s7093_s19 = smov 48  }
  0x26   : > { %5981 = dma.hbm_to_vmem [thread:$0]  (!%p7172_p6), %s7538_s2, 36864, %s7161_s25, [#allocation8], %s7092_s18, %s7092_s18, %s7093_s19  }
  0x27   : > { %s6899_s9 = scalar_lea.hbm %s7540_s4, 36864 }
  0x28   : > { %p6900_p4 = scmp.ne.s32.totalorder %s7540_s4, %s6899_s9  ;;  %p6906_p12 = scmp.lt.u32.totalorder %s6899_s9, %s7540_s4 }
  0x2a   : > { %p6902_p10 = pnand %p6900_p4, %p7188_p8 }
  0x2c   : > { %p6903_p11 = pneg %p6902_p10 }
  0x2e   : > { %p6908_p13 = pnand %p6906_p12, %p6903_p11 }
  0x30   : > { %6911 = shalt.err (!%p6908_p13)
}
  0x31   : > { %s6912_s25 = scalar_lea.vmem %s7176_s29, 36864  ;;  %p6920_p7 = scmp.lt.s32.totalorder %s7176_s29, %s7176_s29 }
  0x32   : > { %p6913_p0 = scmp.ne.s32.totalorder %s7176_s29, %s6912_s25  ;;  %p6921_p9 = scmp.lt.s32.totalorder %s6912_s25, %s6912_s25 }
  0x34   : > { %p6915_p2 = pnand %p6913_p0, %p7188_p8  ;;  %p6922_p4 = por %p6921_p9, %p6920_p7 }
  0x36   : > { %p6916_p5 = pneg %p6915_p2 }
  0x38   : > { %p6923_p10 = pnand %p6922_p4, %p6916_p5 }
  0x3a   : > { %6926 = shalt.err (!%p6923_p10)
}
  0x3b   : > { %s7094_s15 = smov 192   ;;  %s7095_s16 = smov 12  }
  0x3c   : > { %5987 = dma.hbm_to_vmem [thread:$0]  (!%p7172_p6), %s7540_s4, 36864, %s7176_s29, [#allocation11], %s7094_s15, %s7094_s15, %s7095_s16  }
  0x3d   : > { %s6927_s24 = scalar_lea.hbm %s7539_s3, 192 }
  0x3e   : > { %p6928_p11 = scmp.ne.s32.totalorder %s7539_s3, %s6927_s24  ;;  %p6934_p0 = scmp.lt.u32.totalorder %s6927_s24, %s7539_s3 }
  0x40   : > { %p6930_p12 = pnand %p6928_p11, %p7188_p8 }
  0x42   : > { %p6931_p13 = pneg %p6930_p12 }
  0x44   : > { %p6936_p2 = pnand %p6934_p0, %p6931_p13 }
  0x46   : > { %6939 = shalt.err (!%p6936_p2)
}
  0x47   : > { %s6940_s11 = scalar_lea.vmem %s193_s8, 192  ;;  %p6948_p4 = scmp.lt.s32.totalorder %s193_s8, %s193_s8 }
  0x48   : > { %p6941_p5 = scmp.ne.s32.totalorder %s193_s8, %s6940_s11  ;;  %p6949_p10 = scmp.lt.s32.totalorder %s6940_s11, %s6940_s11 }
  0x4a   : > { %p6943_p7 = pnand %p6941_p5, %p7188_p8  ;;  %p6950_p1 = por %p6949_p10, %p6948_p4 }
  0x4c   : > { %p6944_p9 = pneg %p6943_p7 }
  0x4e   : > { %p6951_p3 = pnand %p6950_p1, %p6944_p9 }
  0x50   : > { %6954 = shalt.err (!%p6951_p3)
}
  0x51   : > { %5984 = dma.hbm_to_vmem [thread:$0]  (!%p7172_p6), %s7539_s3, 192, %s193_s8, [#allocation8]  }
  0x52   : > { %s7096_s13 = smov [#allocation12]   ;;  %s6955_s17 = scalar_lea.hbm %s7541_s5, 48 }
  0x53   : > { %s216_s25 = sshll.u32 %s7096_s13, 4  ;;  %p6956_p11 = scmp.ne.s32.totalorder %s7541_s5, %s6955_s17  ;;  %s217_s25 = int_to_ptr.vmem [resolvable:$true] %s216_s25 }
  0x54   : > { %p6962_p12 = scmp.lt.u32.totalorder %s6955_s17, %s7541_s5 }
  0x55   : > { %p6958_p1 = pnand %p6956_p11, %p7188_p8 }
  0x57   : > { %p6959_p3 = pneg %p6958_p1 }
  0x59   : > { %p6964_p13 = pnand %p6962_p12, %p6959_p3 }
  0x5b   : > { %6967 = shalt.err (!%p6964_p13)
}
  0x5c   : > { %s6968_s8 = scalar_lea.vmem %s217_s25, 48  ;;  %s6975_s28 = scalar_lea.vmem %s217_s25, 64 }
  0x5d   : > { %p6969_p0 = scmp.ne.s32.totalorder %s217_s25, %s6968_s8  ;;  %p6976_p7 = scmp.lt.s32.totalorder %s217_s25, %s217_s25 }
  0x5e   : > { %p6977_p9 = scmp.lt.s32.totalorder %s6975_s28, %s6968_s8 }
  0x5f   : > { %p6971_p2 = pnand %p6969_p0, %p7188_p8 }
  0x60   : > { %p6978_p4 = por %p6977_p9, %p6976_p7 }
  0x61   : > { %p6972_p5 = pneg %p6971_p2 }
  0x63   : > { %p6979_p10 = pnand %p6978_p4, %p6972_p5 }
  0x65   : > { %6982 = shalt.err (!%p6979_p10)
}
  0x66   : > { %5990 = dma.hbm_to_vmem [thread:$0]  (!%p7172_p6), %s7541_s5, 48, %s217_s25, [#allocation11]  }
  0x67   : > { %s5168_s14 = sadd.s32 4294967294, %s7087_s23   ;;  %s7271_s30 = sadd.s32 1, %s7087_s23  }
  0x68   : > { %s29_s10 = ssub.s32 %s7087_s23, %s7271_s30  ;;  %s32_s11 = sadd.s32 1, %s7083_s22 }
  0x69   : > { %p30_p8 = scmp.eq.s32.totalorder %s29_s10, 0  ;;  %p39_p11 = scmp.ne.s32.totalorder %s7083_s22, %s7079_s21 }
  0x6a   : > { %p40_p1 = scmp.eq.s32.totalorder %s7087_s23, 0  ;;  %p45_p3 = scmp.ne.s32.totalorder %s7079_s21, %s7075_s0 }
  0x6b   : > { %s7282_s29 = scalar_select %p30_p8, %s7083_s22, %s32_s11  }
  0x6c   : > { %p41_p12 = por %p40_p1, %p39_p11  ;;  %p7549_p13 = scmp.eq.s32.totalorder %s7156_s26, 0 }
  0x6d   : > { %p153_p6 = scmp.eq.s32.totalorder %s7156_s26, 1  ;;  %p159_p2 = scmp.eq.s32.totalorder %s5168_s14, 1 }
  0x6e   : > { %p7286_p0 = por %p7549_p13, %p45_p3  ;;  %p6003_p5 = scmp.lt.s32.totalorder %s7087_s23, 2 }
  0x6f   : > { %s227_s13 = sand.u32 1, %s7083_s22   ;;  %p7293_p7 = por %p153_p6, %p39_p11 }
  0x70   : > { %p7297_p9 = por %p159_p2, %p45_p3  ;;  %s5953_s16 = smul.u32 12, %s227_s13 }
  0x71   : > { %s7551_s25 = scalar_select %p7293_p7, 1, 0 }
  0x72   : > { %s7552_s15 = scalar_select %p7297_p9, 1, 0 }
  0x73   : > { %s5954_s17 = smul.u32 192, %s7087_s23  ;;  %p7302_p4 = pnand %p6003_p5, %p41_p12 }
  0x74   : > { %s231_s8 = scalar_lea.vmem [#allocation4], %s5953_s16  ;;  %s228_s7 = scalar_lea.sflag [#allocation5], %s227_s13 }
  0x75   : > { %s7309_s24 = scalar_lea.hbm %s7537_s1, %s5954_s17  ;;  %s239_s28 = sshll.u32 %s231_s8, 4  ;;  %s7311_s28 = int_to_ptr.vmem [resolvable:$true] %s239_s28 }
  0x76   : > { %s6983_s9 = scalar_lea.hbm %s7309_s24, 192  ;;  %p6985_p8 = pneg %p7302_p4 }
  0x77   : > { %p6984_p10 = scmp.ne.s32.totalorder %s7309_s24, %s6983_s9  ;;  %s6988_s11 = scalar_lea.hbm %s7537_s1, 384 }
  0x78   : > { %p6989_p3 = scmp.lt.u32.totalorder %s7309_s24, %s7537_s1  ;;  %p6990_p12 = scmp.lt.u32.totalorder %s6988_s11, %s6983_s9 }
  0x79   : > { %p6986_p11 = pnand %p6985_p8, %p6984_p10  ;;  %p6992_p6 = scmp.lt.u32.totalorder %s6983_s9, %s7309_s24 }
  0x7a   : > { %p6991_p13 = por %p6990_p12, %p6989_p3 }
  0x7b   : > { %p6987_p1 = pneg %p6986_p11 }
  0x7c   : > { %p6993_p2 = por %p6992_p6, %p6991_p13 }
  0x7e   : > { %p6994_p5 = pnand %p6993_p2, %p6987_p1 }
  0x80   : > { %6997 = shalt.err (!%p6994_p5)
}
  0x81   : > { %s6998_s13 = scalar_lea.vmem %s7311_s28, 192  ;;  %s7097_s16 = smov [#allocation4]  }
  0x82   : > { %p6999_p10 = scmp.ne.s32.totalorder %s7311_s28, %s6998_s13  ;;  %s7003_s20 = sshll.u32 %s7097_s16, 4  ;;  %s7004_s20 = int_to_ptr.vmem [resolvable:$false] %s7003_s20 }
  0x83   : > { %s7005_s8 = scalar_lea.vmem %s7004_s20, 384  ;;  %p7006_p7 = scmp.lt.s32.totalorder %s7311_s28, %s7004_s20 }
  0x84   : > { %p7001_p11 = pnand %p6999_p10, %p6985_p8  ;;  %p7007_p3 = scmp.lt.s32.totalorder %s7005_s8, %s6998_s13 }
  0x86   : > { %p7002_p9 = pneg %p7001_p11  ;;  %p7008_p12 = por %p7007_p3, %p7006_p7 }
  0x88   : > { %p7009_p13 = pnand %p7008_p12, %p7002_p9 }
  0x8a   : > { %7012 = shalt.err (!%p7009_p13)
}
  0x8b   : > { %5994 = dma.hbm_to_vmem [thread:$0]  (!%p7302_p4), %s7309_s24, 192, %s7311_s28, %s228_s7  }
  0x8c   : > { %p7554_p1 = scmp.ne.s32.totalorder %s7546_s27, 0 }
  0x8d   : > { %s7341_s9 = sand.u32 (!%p7554_p1), 1, %s7079_s21  }
  0x8e   : > { %248 = sbr.rel (%p7554_p1) target bundleno = 1054 (0x41e), region = 40  ;;  %s251_s10 = scalar_lea.sflag (!%p7554_p1), [#allocation5], %s7341_s9 }
  0x8f   : > { %s5955_s14 = smul.u32 (!%p7554_p1), 12, %s7341_s9 }
  0x91   : > { %s7345_s11 = scalar_lea.vmem (!%p7554_p1), [#allocation4], %s5955_s14 }
  0x95   : > { %7058 = dma.done.wait (%p7286_p0), %s251_s10, 192  }
  0x96   : > { %7060 = vsyncadd (%p7286_p0), %s251_s10, 4294967104  ;;  %p7555_p7 = scmp.eq.s32.totalorder %s7156_s26, 0 }
  0x98   : > { %7062 = dma.done.wait (%p7555_p7), [#allocation8], 37056   ;;  %p7556_p9 = pmov %p7555_p7 }
  0x99   : > { %p7557_p4 = pmov %p7555_p7 }
  0x9a   : > { %7064 = vsyncadd (%p7556_p9), [#allocation8], 4294930240 }
  0x9b   : > { %7066 = dma.done.wait (%p7557_p4), [#allocation11], 36912   ;;  %p7558_p8 = pmov %p7557_p4 }
  0x9c   : > { %v6050_v0 = vld [vmem:[#allocation7 + $0x4] ss:$48 sps:$4 sm:$0xff]   ;;  %v6052_v1 = vld [vmem:[#allocation7] ss:$48 sps:$4 sm:$0xff]   ;;  %s5956_s27 = smul.u32 24, %s7341_s9  ;;  %p7559_p6 = scmp.ne.s32.totalorder %s7551_s25, 0 }
  0x9d   : > { %7068 = vsyncadd (%p7558_p8), [#allocation11], 4294930384  ;;  %2103 = vmatprep.subr.bf16.mxu1 %v6050_v0  ;;  %v6053_v2 = vld [vmem:[#allocation7 + $0x64] ss:$48 sps:$4 sm:$0xff]   ;;  %v6055_v3 = vld [vmem:[#allocation7 + $0x60] ss:$48 sps:$4 sm:$0xff]  }
  0x9e   : > { %2104 = vmatpush1.bf16.msra.mxu1 %v6052_v1  ;;  %v6056_v4 = vld [vmem:[#allocation7 + $0xc4] ss:$48 sps:$4 sm:$0xff]   ;;  %v6058_v5 = vld [vmem:[#allocation7 + $0xc0] ss:$48 sps:$4 sm:$0xff]   ;;  %v7098_v0 = vmov 0   ;;  %s296_s12 = scalar_lea.vmem [#allocation13], %s5956_s27 }
  0x9f   : > { %2105 = vmatprep.subr.bf16.mxu1 %v6053_v2  ;;  %v6059_v6 = vld [vmem:[#allocation7 + $0x124] ss:$48 sps:$4 sm:$0xff]   ;;  %v6061_v7 = vld [vmem:[#allocation7 + $0x120] ss:$48 sps:$4 sm:$0xff]   ;;  %s5957_s18 = smul.u32 384, %s7156_s26  ;;  %s5060_s24 = sshll.u32 %s296_s12, 4  ;;  %s7494_s24 = int_to_ptr.vmem [resolvable:$true] %s5060_s24 }
  0xa0   : > { %v6062_v8 = vld [vmem:[#allocation7 + $0x184] ss:$48 sps:$4 sm:$0xff]   ;;  %v6064_v9 = vld [vmem:[#allocation7 + $0x180] ss:$48 sps:$4 sm:$0xff]   ;;  %s5046_s26 = scalar_lea.sflag [#allocation6], %s7341_s9  ;;  %s7013_s19 = scalar_lea.vmem %s7494_s24, 384 }
  0xa1   : > { %v6065_v10 = vld [vmem:[#allocation7 + $0x1e4] ss:$48 sps:$4 sm:$0xff]   ;;  %v6067_v11 = vld [vmem:[#allocation7 + $0x1e0] ss:$48 sps:$4 sm:$0xff]   ;;  %s7492_s17 = scalar_lea.hbm %s7542_s6, %s5957_s18  ;;  %p7014_p0 = scmp.ne.s32.totalorder %s7494_s24, %s7013_s19 }
  0xa2   : > { %2106 = vmatpush1.bf16.msra.mxu1 %v6055_v3  ;;  %v6068_v12 = vld [vmem:[#allocation7 + $0x244] ss:$48 sps:$4 sm:$0xff]   ;;  %v6097_v14 = vld [vmem:[#allocation7 + $0x10] ss:$48 sps:$4 sm:$0xff]   ;;  %s7099_s13 = smov [#allocation13]  }
  0xa3   : > { %2107 = vmatprep.subr.bf16.mxu1 %v6056_v4  ;;  %v6095_v13 = vld [vmem:[#allocation7 + $0x14] ss:$48 sps:$4 sm:$0xff]   ;;  %v6070_v15 = vld [vmem:[#allocation7 + $0x240] ss:$48 sps:$4 sm:$0xff]   ;;  %p7015_p2 = pnand %p7014_p0, %p7559_p6  ;;  %s7017_s16 = sshll.u32 %s7099_s13, 4  ;;  %s7018_s16 = int_to_ptr.vmem [resolvable:$false] %s7017_s16 }
  0xa4   : > { %v6071_v16 = vld [vmem:[#allocation7 + $0x2a4] ss:$48 sps:$4 sm:$0xff]   ;;  %2267 = vmatprep.subr.bf16.mxu0 %v6095_v13  ;;  %v6103_v18 = vld [vmem:[#allocation7 + $0x70] ss:$48 sps:$4 sm:$0xff]   ;;  %s7019_s20 = scalar_lea.vmem %s7018_s16, 768  ;;  %p7020_p10 = scmp.lt.s32.totalorder %s7494_s24, %s7018_s16 }
  0xa5   : > { %2268 = vmatpush1.bf16.msra.mxu0 %v6097_v14  ;;  %v6101_v17 = vld [vmem:[#allocation7 + $0x74] ss:$48 sps:$4 sm:$0xff]   ;;  %v6073_v21 = vld [vmem:[#allocation7 + $0x2a0] ss:$48 sps:$4 sm:$0xff]   ;;  %p7016_p5 = pneg %p7015_p2  ;;  %p7021_p11 = scmp.lt.s32.totalorder %s7019_s20, %s7013_s19 }
  0xa6   : > { %2108 = vmatpush1.bf16.msra.mxu1 %v6058_v5  ;;  %v7360_v19 = vld [vmem:[%s7345_s11] sm:$0xff]  ;;  %2269 = vmatprep.subr.bf16.mxu0 %v6101_v17  ;;  %v6111_v23 = vld [vmem:[#allocation7 + $0xd0] ss:$48 sps:$4 sm:$0xff]  }
  0xa7   : > { %2109 = vmatprep.subr.bf16.mxu1 %v6059_v6  ;;  %v7364_v20 = vcombine.high %v7360_v19, %v7360_v19  ;;  %v6109_v22 = vld [vmem:[#allocation7 + $0xd4] ss:$48 sps:$4 sm:$0xff]   ;;  %v6076_v26 = vld [vmem:[#allocation7 + $0x300] ss:$48 sps:$4 sm:$0xff]   ;;  %v7370_v58 = vcombine.low %v7360_v19, %v7360_v19  ;;  %p7022_p3 = por %p7021_p11, %p7020_p10 }
  0xa8   : > { %v6074_v24 = vld [vmem:[#allocation7 + $0x304] ss:$48 sps:$4 sm:$0xff]   ;;  %v6117_v28 = vld [vmem:[#allocation7 + $0x130] ss:$48 sps:$4 sm:$0xff]  }
  0xa9   : > { %2270 = vmatpush1.bf16.msra.mxu0 %v6103_v18  ;;  %2135 = vmatprep.mubr.bf16.mxu1 %v7364_v20  ;;  %v6115_v25 = vld [vmem:[#allocation7 + $0x134] ss:$48 sps:$4 sm:$0xff]   ;;  %v6079_v30 = vld [vmem:[#allocation7 + $0x360] ss:$48 sps:$4 sm:$0xff]   ;;  %p7023_p12 = pnand %p7022_p3, %p7016_p5 }
  0xaa   : > { %2110 = vmatpush1.bf16.msra.mxu1 %v6061_v7  ;;  %2271 = vmatprep.subr.bf16.mxu0 %v6109_v22  ;;  %v6077_v27 = vld [vmem:[#allocation7 + $0x364] ss:$48 sps:$4 sm:$0xff]   ;;  %v6123_v32 = vld [vmem:[#allocation7 + $0x190] ss:$48 sps:$4 sm:$0xff]  }
  0xab   : > { %2111 = vmatprep.subr.bf16.mxu1 %v6062_v8  ;;  %2299 = vmatprep.mubr.bf16.mxu0 %v7364_v20  ;;  %v6121_v29 = vld [vmem:[#allocation7 + $0x194] ss:$48 sps:$4 sm:$0xff]   ;;  %v6082_v34 = vld [vmem:[#allocation7 + $0x3c0] ss:$48 sps:$4 sm:$0xff]  }
  0xac   : > { %v6080_v31 = vld [vmem:[#allocation7 + $0x3c4] ss:$48 sps:$4 sm:$0xff]   ;;  %v6129_v36 = vld [vmem:[#allocation7 + $0x1f0] ss:$48 sps:$4 sm:$0xff]  }
  0xad   : > { %2272 = vmatpush1.bf16.msra.mxu0 %v6111_v23  ;;  %v6127_v33 = vld [vmem:[#allocation7 + $0x1f4] ss:$48 sps:$4 sm:$0xff]   ;;  %v6085_v38 = vld [vmem:[#allocation7 + $0x420] ss:$48 sps:$4 sm:$0xff]  }
  0xae   : > { %2112 = vmatpush1.bf16.msra.mxu1 %v6064_v9  ;;  %2273 = vmatprep.subr.bf16.mxu0 %v6115_v25  ;;  %v6083_v35 = vld [vmem:[#allocation7 + $0x424] ss:$48 sps:$4 sm:$0xff]   ;;  %v6135_v40 = vld [vmem:[#allocation7 + $0x250] ss:$48 sps:$4 sm:$0xff]  }
  0xaf   : > { %2113 = vmatprep.subr.bf16.mxu1 %v6065_v10  ;;  %v6133_v37 = vld [vmem:[#allocation7 + $0x254] ss:$48 sps:$4 sm:$0xff]   ;;  %v6088_v42 = vld [vmem:[#allocation7 + $0x480] ss:$48 sps:$4 sm:$0xff]  }
  0xb0   : > { %v6086_v39 = vld [vmem:[#allocation7 + $0x484] ss:$48 sps:$4 sm:$0xff]   ;;  %v6141_v43 = vld [vmem:[#allocation7 + $0x2b0] ss:$48 sps:$4 sm:$0xff]  }
  0xb1   : > { %2274 = vmatpush1.bf16.msra.mxu0 %v6117_v28  ;;  %v6139_v41 = vld [vmem:[#allocation7 + $0x2b4] ss:$48 sps:$4 sm:$0xff]   ;;  %v6091_v46 = vld [vmem:[#allocation7 + $0x4e0] ss:$48 sps:$4 sm:$0xff]  }
  0xb2   : > { %2114 = vmatpush1.bf16.msra.mxu1 %v6067_v11  ;;  %2275 = vmatprep.subr.bf16.mxu0 %v6121_v29  ;;  %v6089_v44 = vld [vmem:[#allocation7 + $0x4e4] ss:$48 sps:$4 sm:$0xff]   ;;  %v6147_v47 = vld [vmem:[#allocation7 + $0x310] ss:$48 sps:$4 sm:$0xff]  }
  0xb3   : > { %2115 = vmatprep.subr.bf16.mxu1 %v6068_v12  ;;  %v6145_v45 = vld [vmem:[#allocation7 + $0x314] ss:$48 sps:$4 sm:$0xff]   ;;  %v6094_v50 = vld [vmem:[#allocation7 + $0x540] ss:$48 sps:$4 sm:$0xff]  }
  0xb4   : > { %v6092_v48 = vld [vmem:[#allocation7 + $0x544] ss:$48 sps:$4 sm:$0xff]   ;;  %v6153_v51 = vld [vmem:[#allocation7 + $0x370] ss:$48 sps:$4 sm:$0xff]  }
  0xb5   : > { %2276 = vmatpush1.bf16.msra.mxu0 %v6123_v32  ;;  %v6151_v49 = vld [vmem:[#allocation7 + $0x374] ss:$48 sps:$4 sm:$0xff]   ;;  %v6100_v54 = vld [vmem:[#allocation7 + $0x5a0] ss:$48 sps:$4 sm:$0xff]  }
  0xb6   : > { %2116 = vmatpush1.bf16.msra.mxu1 %v6070_v15  ;;  %2277 = vmatprep.subr.bf16.mxu0 %v6127_v33  ;;  %v6098_v52 = vld [vmem:[#allocation7 + $0x5a4] ss:$48 sps:$4 sm:$0xff]   ;;  %v6160_v55 = vld [vmem:[#allocation7 + $0x3d0] ss:$48 sps:$4 sm:$0xff]  }
  0xb7   : > { %2117 = vmatprep.subr.bf16.mxu1 %v6071_v16  ;;  %v6158_v53 = vld [vmem:[#allocation7 + $0x3d4] ss:$48 sps:$4 sm:$0xff]   ;;  %v6105_v59 = vld [vmem:[#allocation7 + $0x600] ss:$48 sps:$4 sm:$0xff]  }
  0xb8   : > { %v6107_v56 = vld [vmem:[#allocation7 + $0x604] ss:$48 sps:$4 sm:$0xff]   ;;  %v6166_v61 = vld [vmem:[#allocation7 + $0x430] ss:$48 sps:$4 sm:$0xff]  }
  0xb9   : > { %2278 = vmatpush1.bf16.msra.mxu0 %v6129_v36  ;;  %v6164_v57 = vld [vmem:[#allocation7 + $0x434] ss:$48 sps:$4 sm:$0xff]   ;;  %v6112_v63 = vld [vmem:[#allocation7 + $0x660] ss:$48 sps:$4 sm:$0xff]  }
  0xba   : > { %2118 = vmatpush1.bf16.msra.mxu1 %v6073_v21  ;;  %2279 = vmatprep.subr.bf16.mxu0 %v6133_v37  ;;  %v6114_v60 = vld [vmem:[#allocation7 + $0x664] ss:$48 sps:$4 sm:$0xff]   ;;  %v6172_v2 = vld [vmem:[#allocation7 + $0x490] ss:$48 sps:$4 sm:$0xff]  }
  0xbb   : > { %2119 = vmatprep.subr.bf16.mxu1 %v6074_v24  ;;  %v6170_v62 = vld [vmem:[#allocation7 + $0x494] ss:$48 sps:$4 sm:$0xff]   ;;  %v6118_v4 = vld [vmem:[#allocation7 + $0x6c0] ss:$48 sps:$4 sm:$0xff]  }
  0xbc   : > { %v6120_v1 = vld [vmem:[#allocation7 + $0x6c4] ss:$48 sps:$4 sm:$0xff]   ;;  %v6178_v6 = vld [vmem:[#allocation7 + $0x4f0] ss:$48 sps:$4 sm:$0xff]  }
  0xbd   : > { %2280 = vmatpush1.bf16.msra.mxu0 %v6135_v40  ;;  %v6176_v3 = vld [vmem:[#allocation7 + $0x4f4] ss:$48 sps:$4 sm:$0xff]   ;;  %v6124_v8 = vld [vmem:[#allocation7 + $0x720] ss:$48 sps:$4 sm:$0xff]  }
  0xbe   : > { %2120 = vmatpush1.bf16.msra.mxu1 %v6076_v26  ;;  %2281 = vmatprep.subr.bf16.mxu0 %v6139_v41  ;;  %v6126_v5 = vld [vmem:[#allocation7 + $0x724] ss:$48 sps:$4 sm:$0xff]   ;;  %v6184_v10 = vld [vmem:[#allocation7 + $0x550] ss:$48 sps:$4 sm:$0xff]   ;;  %v6157_v26 = vld [vmem:[#allocation7 + $0xc] ss:$48 sps:$4 sm:$0xff]  }
  0xbf   : > { %2121 = vmatprep.subr.bf16.mxu1 %v6077_v27  ;;  %v6182_v7 = vld [vmem:[#allocation7 + $0x554] ss:$48 sps:$4 sm:$0xff]   ;;  %v6130_v12 = vld [vmem:[#allocation7 + $0x780] ss:$48 sps:$4 sm:$0xff]  }
  0xc0   : > { %v6132_v9 = vld [vmem:[#allocation7 + $0x784] ss:$48 sps:$4 sm:$0xff]   ;;  %v6190_v14 = vld [vmem:[#allocation7 + $0x5b0] ss:$48 sps:$4 sm:$0xff]  }
  0xc1   : > { %2282 = vmatpush1.bf16.msra.mxu0 %v6141_v43  ;;  %v6188_v11 = vld [vmem:[#allocation7 + $0x5b4] ss:$48 sps:$4 sm:$0xff]   ;;  %v6136_v16 = vld [vmem:[#allocation7 + $0x7e0] ss:$48 sps:$4 sm:$0xff]   ;;  %v6181_v43 = vld [vmem:[#allocation7 + $0x18c] ss:$48 sps:$4 sm:$0xff]  }
  0xc2   : > { %2122 = vmatpush1.bf16.msra.mxu1 %v6079_v30  ;;  %2283 = vmatprep.subr.bf16.mxu0 %v6145_v45  ;;  %v6138_v13 = vld [vmem:[#allocation7 + $0x7e4] ss:$48 sps:$4 sm:$0xff]   ;;  %v6194_v18 = vld [vmem:[#allocation7 + $0x610] ss:$48 sps:$4 sm:$0xff]   ;;  %v6155_v30 = vld [vmem:[#allocation7 + $0x8] ss:$48 sps:$4 sm:$0xff]  }
  0xc3   : > { %2123 = vmatprep.subr.bf16.mxu1 %v6080_v31  ;;  %v6196_v15 = vld [vmem:[#allocation7 + $0x614] ss:$48 sps:$4 sm:$0xff]   ;;  %v6142_v21 = vld [vmem:[#allocation7 + $0x840] ss:$48 sps:$4 sm:$0xff]   ;;  %v6163_v31 = vld [vmem:[#allocation7 + $0x6c] ss:$48 sps:$4 sm:$0xff]  }
  0xc4   : > { %v6144_v17 = vld [vmem:[#allocation7 + $0x844] ss:$48 sps:$4 sm:$0xff]   ;;  %v6200_v23 = vld [vmem:[#allocation7 + $0x670] ss:$48 sps:$4 sm:$0xff]  }
  0xc5   : > { %2284 = vmatpush1.bf16.msra.mxu0 %v6147_v47  ;;  %v6202_v19 = vld [vmem:[#allocation7 + $0x674] ss:$48 sps:$4 sm:$0xff]   ;;  %v6148_v25 = vld [vmem:[#allocation7 + $0x8a0] ss:$48 sps:$4 sm:$0xff]   ;;  %v6187_v47 = vld [vmem:[#allocation7 + $0x1ec] ss:$48 sps:$4 sm:$0xff]  }
  0xc6   : > { %2124 = vmatpush1.bf16.msra.mxu1 %v6082_v34  ;;  %2285 = vmatprep.subr.bf16.mxu0 %v6151_v49  ;;  %v6150_v22 = vld [vmem:[#allocation7 + $0x8a4] ss:$48 sps:$4 sm:$0xff]   ;;  %v6206_v27 = vld [vmem:[#allocation7 + $0x6d0] ss:$48 sps:$4 sm:$0xff]   ;;  %v6161_v34 = vld [vmem:[#allocation7 + $0x68] ss:$48 sps:$4 sm:$0xff]  }
  0xc7   : > { %2125 = vmatprep.subr.bf16.mxu1 %v6083_v35  ;;  %v6208_v24 = vld [vmem:[#allocation7 + $0x6d4] ss:$48 sps:$4 sm:$0xff]   ;;  %v7377_v29 = vld [vmem:[%s7345_s11 + $0x8] ss:$0 sps:$4 sm:$0xff]  }
  0xc8   : > { %v6214_v28 = vld [vmem:[#allocation7 + $0x734] ss:$48 sps:$4 sm:$0xff]   ;;  %v6212_v32 = vld [vmem:[#allocation7 + $0x730] ss:$48 sps:$4 sm:$0xff]   ;;  %v6169_v35 = vld [vmem:[#allocation7 + $0xcc] ss:$48 sps:$4 sm:$0xff]  }
  0xc9   : > { %2286 = vmatpush1.bf16.msra.mxu0 %v6153_v51  ;;  %v6220_v33 = vld [vmem:[#allocation7 + $0x794] ss:$48 sps:$4 sm:$0xff]   ;;  %v6218_v36 = vld [vmem:[#allocation7 + $0x790] ss:$48 sps:$4 sm:$0xff]   ;;  %v6193_v51 = vld [vmem:[#allocation7 + $0x24c] ss:$48 sps:$4 sm:$0xff]  }
  0xca   : > { %2126 = vmatpush1.bf16.msra.mxu1 %v6085_v38  ;;  %2287 = vmatprep.subr.bf16.mxu0 %v6158_v53  ;;  %v6226_v37 = vld [vmem:[#allocation7 + $0x7f4] ss:$48 sps:$4 sm:$0xff]   ;;  %v6167_v38 = vld [vmem:[#allocation7 + $0xc8] ss:$48 sps:$4 sm:$0xff]   ;;  %v6224_v40 = vld [vmem:[#allocation7 + $0x7f0] ss:$48 sps:$4 sm:$0xff]  }
  0xcb   : > { %2127 = vmatprep.subr.bf16.mxu1 %v6086_v39  ;;  %v6175_v39 = vld [vmem:[#allocation7 + $0x12c] ss:$48 sps:$4 sm:$0xff]   ;;  %v6232_v41 = vld [vmem:[#allocation7 + $0x854] ss:$48 sps:$4 sm:$0xff]  }
  0xcc   : > { %v6238_v45 = vld [vmem:[#allocation7 + $0x8b4] ss:$48 sps:$4 sm:$0xff]  }
  0xcd   : > { %2288 = vmatpush1.bf16.msra.mxu0 %v6160_v55  ;;  %v6244_v49 = vld [vmem:[#allocation7 + $0x24] ss:$48 sps:$4 sm:$0xff]   ;;  %v6199_v55 = vld [vmem:[#allocation7 + $0x2ac] ss:$48 sps:$4 sm:$0xff]  }
  0xce   : > { %2128 = vmatpush1.bf16.msra.mxu1 %v6088_v42  ;;  %2289 = vmatprep.subr.bf16.mxu0 %v6164_v57  ;;  %v6173_v42 = vld [vmem:[#allocation7 + $0x128] ss:$48 sps:$4 sm:$0xff]   ;;  %v6250_v53 = vld [vmem:[#allocation7 + $0x84] ss:$48 sps:$4 sm:$0xff]  }
  0xcf   : > { %2129 = vmatprep.subr.bf16.mxu1 %v6089_v44  ;;  %v6230_v44 = vld [vmem:[#allocation7 + $0x850] ss:$48 sps:$4 sm:$0xff]   ;;  %v6256_v57 = vld [vmem:[#allocation7 + $0xe4] ss:$48 sps:$4 sm:$0xff]  }
  0xd1   : > { %2290 = vmatpush1.bf16.msra.mxu0 %v6166_v61  ;;  %v6254_v61 = vld [vmem:[#allocation7 + $0xe0] ss:$48 sps:$4 sm:$0xff]  }
  0xd2   : > { %2130 = vmatpush1.bf16.msra.mxu1 %v6091_v46  ;;  %2291 = vmatprep.subr.bf16.mxu0 %v6170_v62  ;;  %v6179_v46 = vld [vmem:[#allocation7 + $0x188] ss:$48 sps:$4 sm:$0xff]   ;;  %v6262_v62 = vld [vmem:[#allocation7 + $0x144] ss:$48 sps:$4 sm:$0xff]  }
  0xd3   : > { %2131 = vmatprep.subr.bf16.mxu1 %v6092_v48  ;;  %v6236_v48 = vld [vmem:[#allocation7 + $0x8b0] ss:$48 sps:$4 sm:$0xff]  }
  0xd5   : > { %2292 = vmatpush1.bf16.msra.mxu0 %v6172_v2  ;;  %v6260_v2 = vld [vmem:[#allocation7 + $0x140] ss:$48 sps:$4 sm:$0xff]  }
  0xd6   : > { %2132 = vmatpush1.bf16.msra.mxu1 %v6094_v50  ;;  %2293 = vmatprep.subr.bf16.mxu0 %v6176_v3  ;;  %v6185_v50 = vld [vmem:[#allocation7 + $0x1e8] ss:$48 sps:$4 sm:$0xff]   ;;  %v6268_v3 = vld [vmem:[#allocation7 + $0x1a4] ss:$48 sps:$4 sm:$0xff]  }
  0xd7   : > { %2133 = vmatprep.subr.bf16.mxu1 %v6098_v52  ;;  %v6242_v52 = vld [vmem:[#allocation7 + $0x20] ss:$48 sps:$4 sm:$0xff]  }
  0xd9   : > { %2294 = vmatpush1.bf16.msra.mxu0 %v6178_v6  ;;  %v6266_v6 = vld [vmem:[#allocation7 + $0x1a0] ss:$48 sps:$4 sm:$0xff]  }
  0xda   : > { %2134 = vmatpush1.bf16.msra.mxu1 %v6100_v54  ;;  %2295 = vmatprep.subr.bf16.mxu0 %v6182_v7  ;;  %v6191_v54 = vld [vmem:[#allocation7 + $0x248] ss:$48 sps:$4 sm:$0xff]   ;;  %v6274_v7 = vld [vmem:[#allocation7 + $0x204] ss:$48 sps:$4 sm:$0xff]  }
  0xdb   : > { %2144 = vmatprep.subr.bf16.mxu1 %v6107_v56  ;;  %v6248_v56 = vld [vmem:[#allocation7 + $0x80] ss:$48 sps:$4 sm:$0xff]  }
  0xdd   : > { %2136 = vmatmul.mubr.bf16.vlgmr.msra.gmra.mrb[0].mxu1 %v7370_v58  ;;  %2296 = vmatpush1.bf16.msra.mxu0 %v6184_v10  ;;  %v6272_v10 = vld [vmem:[#allocation7 + $0x200] ss:$48 sps:$4 sm:$0xff]  }
  0xde   : > { %2145 = vmatpush1.bf16.msra.mxu1 %v6105_v59  ;;  %2176 = vmatprep.mubr.bf16.mxu1 %v7098_v0  ;;  %v6197_v59 = vld [vmem:[#allocation7 + $0x2a8] ss:$48 sps:$4 sm:$0xff]  }
  0xdf   : > { %2146 = vmatprep.subr.bf16.mxu1 %v6114_v60  ;;  %2297 = vmatprep.subr.bf16.mxu0 %v6188_v11  ;;  %v6205_v60 = vld [vmem:[#allocation7 + $0x30c] ss:$48 sps:$4 sm:$0xff]   ;;  %v6280_v11 = vld [vmem:[#allocation7 + $0x264] ss:$48 sps:$4 sm:$0xff]  }
  0xe1   : > { %2298 = vmatpush1.bf16.msra.mxu0 %v6190_v14  ;;  %v6278_v14 = vld [vmem:[#allocation7 + $0x260] ss:$48 sps:$4 sm:$0xff]  }
  0xe2   : > { %2147 = vmatpush1.bf16.msra.mxu1 %v6112_v63  ;;  %2308 = vmatprep.subr.bf16.mxu0 %v6196_v15  ;;  %v6203_v63 = vld [vmem:[#allocation7 + $0x308] ss:$48 sps:$4 sm:$0xff]   ;;  %v6286_v15 = vld [vmem:[#allocation7 + $0x2c4] ss:$48 sps:$4 sm:$0xff]  }
  0xe3   : > { %2148 = vmatprep.subr.bf16.mxu1 %v6120_v1  ;;  %v6211_v1 = vld [vmem:[#allocation7 + $0x36c] ss:$48 sps:$4 sm:$0xff]  }
  0xe4   : > { %2300 = vmatmul.mubr.bf16.vlgmr.msra.gmra.mrb[0].mxu0 %v7370_v58 }
  0xe5   : > { %2309 = vmatpush1.bf16.msra.mxu0 %v6194_v18  ;;  %2340 = vmatprep.mubr.bf16.mxu0 %v7098_v0  ;;  %v6284_v18 = vld [vmem:[#allocation7 + $0x2c0] ss:$48 sps:$4 sm:$0xff]  }
  0xe6   : > { %2149 = vmatpush1.bf16.msra.mxu1 %v6118_v4  ;;  %2310 = vmatprep.subr.bf16.mxu0 %v6202_v19  ;;  %v6209_v4 = vld [vmem:[#allocation7 + $0x368] ss:$48 sps:$4 sm:$0xff]   ;;  %v6292_v19 = vld [vmem:[#allocation7 + $0x324] ss:$48 sps:$4 sm:$0xff]  }
  0xe7   : > { %2150 = vmatprep.subr.bf16.mxu1 %v6126_v5  ;;  %v6217_v5 = vld [vmem:[#allocation7 + $0x3cc] ss:$48 sps:$4 sm:$0xff]  }
  0xe9   : > { %2311 = vmatpush1.bf16.msra.mxu0 %v6200_v23  ;;  %v6290_v23 = vld [vmem:[#allocation7 + $0x320] ss:$48 sps:$4 sm:$0xff]  }
  0xea   : > { %2151 = vmatpush1.bf16.msra.mxu1 %v6124_v8  ;;  %2312 = vmatprep.subr.bf16.mxu0 %v6208_v24  ;;  %v6215_v8 = vld [vmem:[#allocation7 + $0x3c8] ss:$48 sps:$4 sm:$0xff]   ;;  %v6298_v24 = vld [vmem:[#allocation7 + $0x384] ss:$48 sps:$4 sm:$0xff]  }
  0xeb   : > { %2152 = vmatprep.subr.bf16.mxu1 %v6132_v9  ;;  %v6223_v9 = vld [vmem:[#allocation7 + $0x42c] ss:$48 sps:$4 sm:$0xff]  }
  0xed   : > { %2313 = vmatpush1.bf16.msra.mxu0 %v6206_v27  ;;  %v6296_v27 = vld [vmem:[#allocation7 + $0x380] ss:$48 sps:$4 sm:$0xff]  }
  0xee   : > { %2153 = vmatpush1.bf16.msra.mxu1 %v6130_v12  ;;  %2314 = vmatprep.subr.bf16.mxu0 %v6214_v28  ;;  %v6221_v12 = vld [vmem:[#allocation7 + $0x428] ss:$48 sps:$4 sm:$0xff]   ;;  %v6304_v28 = vld [vmem:[#allocation7 + $0x3e4] ss:$48 sps:$4 sm:$0xff]  }
  0xef   : > { %2154 = vmatprep.subr.bf16.mxu1 %v6138_v13  ;;  %v6229_v13 = vld [vmem:[#allocation7 + $0x48c] ss:$48 sps:$4 sm:$0xff]  }
  0xf1   : > { %2315 = vmatpush1.bf16.msra.mxu0 %v6212_v32  ;;  %v6302_v32 = vld [vmem:[#allocation7 + $0x3e0] ss:$48 sps:$4 sm:$0xff]  }
  0xf2   : > { %2155 = vmatpush1.bf16.msra.mxu1 %v6136_v16  ;;  %2316 = vmatprep.subr.bf16.mxu0 %v6220_v33  ;;  %v6227_v16 = vld [vmem:[#allocation7 + $0x488] ss:$48 sps:$4 sm:$0xff]   ;;  %v6310_v33 = vld [vmem:[#allocation7 + $0x444] ss:$48 sps:$4 sm:$0xff]  }
  0xf3   : > { %2156 = vmatprep.subr.bf16.mxu1 %v6144_v17  ;;  %v6235_v17 = vld [vmem:[#allocation7 + $0x4ec] ss:$48 sps:$4 sm:$0xff]  }
  0xf5   : > { %2317 = vmatpush1.bf16.msra.mxu0 %v6218_v36  ;;  %v6308_v36 = vld [vmem:[#allocation7 + $0x440] ss:$48 sps:$4 sm:$0xff]  }
  0xf6   : > { %2157 = vmatpush1.bf16.msra.mxu1 %v6142_v21  ;;  %2318 = vmatprep.subr.bf16.mxu0 %v6226_v37  ;;  %v6233_v21 = vld [vmem:[#allocation7 + $0x4e8] ss:$48 sps:$4 sm:$0xff]   ;;  %v6316_v37 = vld [vmem:[#allocation7 + $0x4a4] ss:$48 sps:$4 sm:$0xff]  }
  0xf7   : > { %2158 = vmatprep.subr.bf16.mxu1 %v6150_v22  ;;  %v6241_v22 = vld [vmem:[#allocation7 + $0x54c] ss:$48 sps:$4 sm:$0xff]  }
  0xf9   : > { %2319 = vmatpush1.bf16.msra.mxu0 %v6224_v40  ;;  %v6314_v40 = vld [vmem:[#allocation7 + $0x4a0] ss:$48 sps:$4 sm:$0xff]  }
  0xfa   : > { %2159 = vmatpush1.bf16.msra.mxu1 %v6148_v25  ;;  %2320 = vmatprep.subr.bf16.mxu0 %v6232_v41  ;;  %v6239_v25 = vld [vmem:[#allocation7 + $0x548] ss:$48 sps:$4 sm:$0xff]   ;;  %v6322_v41 = vld [vmem:[#allocation7 + $0x504] ss:$48 sps:$4 sm:$0xff]  }
  0xfb   : > { %2185 = vmatprep.subr.bf16.mxu1 %v6157_v26  ;;  %v6247_v26 = vld [vmem:[#allocation7 + $0x5ac] ss:$48 sps:$4 sm:$0xff]  }
  0xfd   : > { %2177 = vmatmul.mubr.bf16.vlgmr.msra.gmra.mrb[0].mxu1 %v7377_v29  ;;  %2321 = vmatpush1.bf16.msra.mxu0 %v6230_v44  ;;  %v6320_v44 = vld [vmem:[#allocation7 + $0x500] ss:$48 sps:$4 sm:$0xff]  }
  0xfe   : > { %2186 = vmatpush1.bf16.msra.mxu1 %v6155_v30  ;;  %2217 = vmatprep.mubr.bf16.mxu1 %v7364_v20  ;;  %v6245_v30 = vld [vmem:[#allocation7 + $0x5a8] ss:$48 sps:$4 sm:$0xff]  }
  0xff   : > { %2187 = vmatprep.subr.bf16.mxu1 %v6163_v31  ;;  %2322 = vmatprep.subr.bf16.mxu0 %v6238_v45  ;;  %v6253_v31 = vld [vmem:[#allocation7 + $0x60c] ss:$48 sps:$4 sm:$0xff]   ;;  %v6328_v45 = vld [vmem:[#allocation7 + $0x564] ss:$48 sps:$4 sm:$0xff]  }
 0x101   : > { %2323 = vmatpush1.bf16.msra.mxu0 %v6236_v48  ;;  %v6326_v48 = vld [vmem:[#allocation7 + $0x560] ss:$48 sps:$4 sm:$0xff]  }
 0x102   : > { %2188 = vmatpush1.bf16.msra.mxu1 %v6161_v34  ;;  %2431 = vmatprep.subr.bf16.mxu0 %v6244_v49  ;;  %v6251_v34 = vld [vmem:[#allocation7 + $0x608] ss:$48 sps:$4 sm:$0xff]   ;;  %v6334_v49 = vld [vmem:[#allocation7 + $0x5c4] ss:$48 sps:$4 sm:$0xff]  }
 0x103   : > { %2189 = vmatprep.subr.bf16.mxu1 %v6169_v35  ;;  %v6259_v35 = vld [vmem:[#allocation7 + $0x66c] ss:$48 sps:$4 sm:$0xff]  }
 0x104   : > { %2341 = vmatmul.mubr.bf16.vlgmr.msra.gmra.mrb[0].mxu0 %v7377_v29 }
 0x105   : > { %2432 = vmatpush1.bf16.msra.mxu0 %v6242_v52  ;;  %2463 = vmatprep.mubr.bf16.mxu0 %v7364_v20  ;;  %v6332_v52 = vld [vmem:[#allocation7 + $0x5c0] ss:$48 sps:$4 sm:$0xff]  }
 0x106   : > { %2190 = vmatpush1.bf16.msra.mxu1 %v6167_v38  ;;  %2433 = vmatprep.subr.bf16.mxu0 %v6250_v53  ;;  %v6257_v38 = vld [vmem:[#allocation7 + $0x668] ss:$48 sps:$4 sm:$0xff]   ;;  %v6340_v53 = vld [vmem:[#allocation7 + $0x624] ss:$48 sps:$4 sm:$0xff]  }
 0x107   : > { %2191 = vmatprep.subr.bf16.mxu1 %v6175_v39  ;;  %v6265_v39 = vld [vmem:[#allocation7 + $0x6cc] ss:$48 sps:$4 sm:$0xff]  }
 0x109   : > { %2434 = vmatpush1.bf16.msra.mxu0 %v6248_v56  ;;  %v6338_v56 = vld [vmem:[#allocation7 + $0x620] ss:$48 sps:$4 sm:$0xff]  }
 0x10a   : > { %2192 = vmatpush1.bf16.msra.mxu1 %v6173_v42  ;;  %2435 = vmatprep.subr.bf16.mxu0 %v6256_v57  ;;  %v6263_v42 = vld [vmem:[#allocation7 + $0x6c8] ss:$48 sps:$4 sm:$0xff]   ;;  %v6346_v57 = vld [vmem:[#allocation7 + $0x684] ss:$48 sps:$4 sm:$0xff]  }
 0x10b   : > { %2193 = vmatprep.subr.bf16.mxu1 %v6181_v43  ;;  %v6271_v43 = vld [vmem:[#allocation7 + $0x72c] ss:$48 sps:$4 sm:$0xff]  }
 0x10d   : > { %2436 = vmatpush1.bf16.msra.mxu0 %v6254_v61  ;;  %v6344_v61 = vld [vmem:[#allocation7 + $0x680] ss:$48 sps:$4 sm:$0xff]  }
 0x10e   : > { %2194 = vmatpush1.bf16.msra.mxu1 %v6179_v46  ;;  %2437 = vmatprep.subr.bf16.mxu0 %v6262_v62  ;;  %v6269_v46 = vld [vmem:[#allocation7 + $0x728] ss:$48 sps:$4 sm:$0xff]   ;;  %v6352_v62 = vld [vmem:[#allocation7 + $0x6e4] ss:$48 sps:$4 sm:$0xff]  }
 0x10f   : > { %2195 = vmatprep.subr.bf16.mxu1 %v6187_v47  ;;  %v6277_v47 = vld [vmem:[#allocation7 + $0x78c] ss:$48 sps:$4 sm:$0xff]  }
 0x111   : > { %2438 = vmatpush1.bf16.msra.mxu0 %v6260_v2  ;;  %v6350_v2 = vld [vmem:[#allocation7 + $0x6e0] ss:$48 sps:$4 sm:$0xff]  }
 0x112   : > { %2196 = vmatpush1.bf16.msra.mxu1 %v6185_v50  ;;  %2439 = vmatprep.subr.bf16.mxu0 %v6268_v3  ;;  %v6275_v50 = vld [vmem:[#allocation7 + $0x788] ss:$48 sps:$4 sm:$0xff]   ;;  %v6358_v3 = vld [vmem:[#allocation7 + $0x744] ss:$48 sps:$4 sm:$0xff]  }
 0x113   : > { %2197 = vmatprep.subr.bf16.mxu1 %v6193_v51  ;;  %v6283_v51 = vld [vmem:[#allocation7 + $0x7ec] ss:$48 sps:$4 sm:$0xff]  }
 0x115   : > { %2440 = vmatpush1.bf16.msra.mxu0 %v6266_v6  ;;  %v6356_v6 = vld [vmem:[#allocation7 + $0x740] ss:$48 sps:$4 sm:$0xff]  }
 0x116   : > { %2198 = vmatpush1.bf16.msra.mxu1 %v6191_v54  ;;  %2441 = vmatprep.subr.bf16.mxu0 %v6274_v7  ;;  %v6281_v54 = vld [vmem:[#allocation7 + $0x7e8] ss:$48 sps:$4 sm:$0xff]   ;;  %v6364_v7 = vld [vmem:[#allocation7 + $0x7a4] ss:$48 sps:$4 sm:$0xff]  }
 0x117   : > { %2199 = vmatprep.subr.bf16.mxu1 %v6199_v55  ;;  %v6289_v55 = vld [vmem:[#allocation7 + $0x84c] ss:$48 sps:$4 sm:$0xff]  }
 0x119   : > { %2442 = vmatpush1.bf16.msra.mxu0 %v6272_v10  ;;  %v6362_v10 = vld [vmem:[#allocation7 + $0x7a0] ss:$48 sps:$4 sm:$0xff]  }
 0x11a   : > { %2200 = vmatpush1.bf16.msra.mxu1 %v6197_v59  ;;  %2443 = vmatprep.subr.bf16.mxu0 %v6280_v11  ;;  %v6287_v59 = vld [vmem:[#allocation7 + $0x848] ss:$48 sps:$4 sm:$0xff]   ;;  %v6370_v11 = vld [vmem:[#allocation7 + $0x804] ss:$48 sps:$4 sm:$0xff]  }
 0x11b   : > { %2201 = vmatprep.subr.bf16.mxu1 %v6205_v60  ;;  %v6295_v60 = vld [vmem:[#allocation7 + $0x8ac] ss:$48 sps:$4 sm:$0xff]  }
 0x11d   : > { %2444 = vmatpush1.bf16.msra.mxu0 %v6278_v14  ;;  %v6368_v14 = vld [vmem:[#allocation7 + $0x800] ss:$48 sps:$4 sm:$0xff]  }
 0x11e   : > { %2202 = vmatpush1.bf16.msra.mxu1 %v6203_v63  ;;  %2445 = vmatprep.subr.bf16.mxu0 %v6286_v15  ;;  %v6293_v63 = vld [vmem:[#allocation7 + $0x8a8] ss:$48 sps:$4 sm:$0xff]   ;;  %v6376_v15 = vld [vmem:[#allocation7 + $0x864] ss:$48 sps:$4 sm:$0xff]  }
 0x11f   : > { %2203 = vmatprep.subr.bf16.mxu1 %v6211_v1  ;;  %v6301_v1 = vld [vmem:[#allocation7 + $0x1c] ss:$48 sps:$4 sm:$0xff]  }
 0x121   : > { %2446 = vmatpush1.bf16.msra.mxu0 %v6284_v18  ;;  %v6374_v18 = vld [vmem:[#allocation7 + $0x860] ss:$48 sps:$4 sm:$0xff]  }
 0x122   : > { %2204 = vmatpush1.bf16.msra.mxu1 %v6209_v4  ;;  %2447 = vmatprep.subr.bf16.mxu0 %v6292_v19  ;;  %v6299_v4 = vld [vmem:[#allocation7 + $0x18] ss:$48 sps:$4 sm:$0xff]   ;;  %v6382_v19 = vld [vmem:[#allocation7 + $0x8c4] ss:$48 sps:$4 sm:$0xff]  }
 0x123   : > { %2205 = vmatprep.subr.bf16.mxu1 %v6217_v5  ;;  %v6307_v5 = vld [vmem:[#allocation7 + $0x7c] ss:$48 sps:$4 sm:$0xff]  }
 0x125   : > { %2448 = vmatpush1.bf16.msra.mxu0 %v6290_v23  ;;  %v6380_v23 = vld [vmem:[#allocation7 + $0x8c0] ss:$48 sps:$4 sm:$0xff]  }
 0x126   : > { %2206 = vmatpush1.bf16.msra.mxu1 %v6215_v8  ;;  %2449 = vmatprep.subr.bf16.mxu0 %v6298_v24  ;;  %v6305_v8 = vld [vmem:[#allocation7 + $0x78] ss:$48 sps:$4 sm:$0xff]   ;;  %v6391_v24 = vld [vmem:[#allocation10 + $0x4] ss:$12 sps:$4 sm:$0xff]  }
 0x127   : > { %2207 = vmatprep.subr.bf16.mxu1 %v6223_v9  ;;  %v6313_v9 = vld [vmem:[#allocation7 + $0xdc] ss:$48 sps:$4 sm:$0xff]  }
 0x129   : > { %2450 = vmatpush1.bf16.msra.mxu0 %v6296_v27  ;;  %v6389_v27 = vld [vmem:[#allocation10] ss:$12 sps:$4 sm:$0xff]  }
 0x12a   : > { %2208 = vmatpush1.bf16.msra.mxu1 %v6221_v12  ;;  %2451 = vmatprep.subr.bf16.mxu0 %v6304_v28  ;;  %v6311_v12 = vld [vmem:[#allocation7 + $0xd8] ss:$48 sps:$4 sm:$0xff]  }
 0x12b   : > { %2209 = vmatprep.subr.bf16.mxu1 %v6229_v13  ;;  %v6319_v13 = vld [vmem:[#allocation7 + $0x13c] ss:$48 sps:$4 sm:$0xff]   ;;  %v6397_v28 = vld [vmem:[#allocation10 + $0x1c] ss:$12 sps:$4 sm:$0xff]  }
 0x12d   : > { %2452 = vmatpush1.bf16.msra.mxu0 %v6302_v32  ;;  %v6395_v32 = vld [vmem:[#allocation10 + $0x18] ss:$12 sps:$4 sm:$0xff]  }
 0x12e   : > { %2210 = vmatpush1.bf16.msra.mxu1 %v6227_v16  ;;  %2453 = vmatprep.subr.bf16.mxu0 %v6310_v33  ;;  %v6317_v16 = vld [vmem:[#allocation7 + $0x138] ss:$48 sps:$4 sm:$0xff]   ;;  %v6403_v33 = vld [vmem:[#allocation10 + $0x34] ss:$12 sps:$4 sm:$0xff]  }
 0x12f   : > { %2211 = vmatprep.subr.bf16.mxu1 %v6235_v17  ;;  %v6325_v17 = vld [vmem:[#allocation7 + $0x19c] ss:$48 sps:$4 sm:$0xff]  }
 0x131   : > { %2454 = vmatpush1.bf16.msra.mxu0 %v6308_v36  ;;  %v6401_v36 = vld [vmem:[#allocation10 + $0x30] ss:$12 sps:$4 sm:$0xff]  }
 0x132   : > { %2212 = vmatpush1.bf16.msra.mxu1 %v6233_v21  ;;  %2455 = vmatprep.subr.bf16.mxu0 %v6316_v37  ;;  %v6323_v21 = vld [vmem:[#allocation7 + $0x198] ss:$48 sps:$4 sm:$0xff]  }
 0x133   : > { %2213 = vmatprep.subr.bf16.mxu1 %v6241_v22  ;;  %v6331_v22 = vld [vmem:[#allocation7 + $0x1fc] ss:$48 sps:$4 sm:$0xff]   ;;  %v6409_v37 = vld [vmem:[#allocation10 + $0x4c] ss:$12 sps:$4 sm:$0xff]  }
 0x135   : > { %2456 = vmatpush1.bf16.msra.mxu0 %v6314_v40  ;;  %v6407_v40 = vld [vmem:[#allocation10 + $0x48] ss:$12 sps:$4 sm:$0xff]  }
 0x136   : > { %2214 = vmatpush1.bf16.msra.mxu1 %v6239_v25  ;;  %2457 = vmatprep.subr.bf16.mxu0 %v6322_v41  ;;  %v6329_v25 = vld [vmem:[#allocation7 + $0x1f8] ss:$48 sps:$4 sm:$0xff]  }
 0x137   : > { %2215 = vmatprep.subr.bf16.mxu1 %v6247_v26  ;;  %v6337_v26 = vld [vmem:[#allocation7 + $0x25c] ss:$48 sps:$4 sm:$0xff]   ;;  %v6353_v41 = vld [vmem:[#allocation7 + $0x378] ss:$48 sps:$4 sm:$0xff]  }
 0x139   : > { %2458 = vmatpush1.bf16.msra.mxu0 %v6320_v44  ;;  %v6421_v44 = vld [vmem:[#allocation10 + $0x7c] ss:$12 sps:$4 sm:$0xff]  }
 0x13a   : > { %2216 = vmatpush1.bf16.msra.mxu1 %v6245_v30  ;;  %2459 = vmatprep.subr.bf16.mxu0 %v6328_v45  ;;  %v6335_v30 = vld [vmem:[#allocation7 + $0x258] ss:$48 sps:$4 sm:$0xff]  }
 0x13b   : > { %2226 = vmatprep.subr.bf16.mxu1 %v6253_v31  ;;  %v6343_v31 = vld [vmem:[#allocation7 + $0x2bc] ss:$48 sps:$4 sm:$0xff]   ;;  %v6359_v45 = vld [vmem:[#allocation7 + $0x3d8] ss:$48 sps:$4 sm:$0xff]  }
 0x13d   : > { %2218 = vmatmul.mubr.bf16.vlgmr.msra.gmra.mrb[4].mxu1 %v7370_v58  ;;  %2460 = vmatpush1.bf16.msra.mxu0 %v6326_v48  ;;  %v6427_v48 = vld [vmem:[#allocation10 + $0x94] ss:$12 sps:$4 sm:$0xff]  }
 0x13e   : > { %2227 = vmatpush1.bf16.msra.mxu1 %v6251_v34  ;;  %2258 = vmatprep.mubr.bf16.mxu1 %v7098_v0  ;;  %v6341_v34 = vld [vmem:[#allocation7 + $0x2b8] ss:$48 sps:$4 sm:$0xff]  }
 0x13f   : > { %2228 = vmatprep.subr.bf16.mxu1 %v6259_v35  ;;  %2461 = vmatprep.subr.bf16.mxu0 %v6334_v49  ;;  %v6349_v35 = vld [vmem:[#allocation7 + $0x31c] ss:$48 sps:$4 sm:$0xff]   ;;  %v6365_v49 = vld [vmem:[#allocation7 + $0x438] ss:$48 sps:$4 sm:$0xff]  }
 0x141   : > { %2462 = vmatpush1.bf16.msra.mxu0 %v6332_v52  ;;  %v6433_v52 = vld [vmem:[#allocation10 + $0xac] ss:$12 sps:$4 sm:$0xff]  }
 0x142   : > { %2229 = vmatpush1.bf16.msra.mxu1 %v6257_v38  ;;  %2472 = vmatprep.subr.bf16.mxu0 %v6340_v53  ;;  %v6347_v38 = vld [vmem:[#allocation7 + $0x318] ss:$48 sps:$4 sm:$0xff]  }
 0x143   : > { %2230 = vmatprep.subr.bf16.mxu1 %v6265_v39  ;;  %v6355_v39 = vld [vmem:[#allocation7 + $0x37c] ss:$48 sps:$4 sm:$0xff]   ;;  %v6371_v53 = vld [vmem:[#allocation7 + $0x498] ss:$48 sps:$4 sm:$0xff]  }
 0x144   : > { %2464 = vmatmul.mubr.bf16.vlgmr.msra.gmra.mrb[4].mxu0 %v7370_v58 }
 0x145   : > { %2473 = vmatpush1.bf16.msra.mxu0 %v6338_v56  ;;  %2504 = vmatprep.mubr.bf16.mxu0 %v7098_v0  ;;  %v6439_v56 = vld [vmem:[#allocation10 + $0xc4] ss:$12 sps:$4 sm:$0xff]  }
 0x146   : > { %2231 = vmatpush1.bf16.msra.mxu1 %v6263_v42  ;;  %2474 = vmatprep.subr.bf16.mxu0 %v6346_v57  ;;  %v6361_v42 = vld [vmem:[#allocation7 + $0x3dc] ss:$48 sps:$4 sm:$0xff]   ;;  %v6377_v57 = vld [vmem:[#allocation7 + $0x4f8] ss:$48 sps:$4 sm:$0xff]  }
 0x147   : > { %2232 = vmatprep.subr.bf16.mxu1 %v6271_v43  ;;  %v6413_v43 = vld [vmem:[#allocation10 + $0x60] ss:$12 sps:$4 sm:$0xff]  }
 0x149   : > { %2475 = vmatpush1.bf16.msra.mxu0 %v6344_v61  ;;  %v6445_v61 = vld [vmem:[#allocation10 + $0xdc] ss:$12 sps:$4 sm:$0xff]  }
 0x14a   : > { %2233 = vmatpush1.bf16.msra.mxu1 %v6269_v46  ;;  %2476 = vmatprep.subr.bf16.mxu0 %v6352_v62  ;;  %v6367_v46 = vld [vmem:[#allocation7 + $0x43c] ss:$48 sps:$4 sm:$0xff]   ;;  %v6383_v62 = vld [vmem:[#allocation7 + $0x558] ss:$48 sps:$4 sm:$0xff]  }
 0x14b   : > { %2234 = vmatprep.subr.bf16.mxu1 %v6277_v47  ;;  %v6419_v47 = vld [vmem:[#allocation10 + $0x78] ss:$12 sps:$4 sm:$0xff]  }
 0x14d   : > { %2477 = vmatpush1.bf16.msra.mxu0 %v6350_v2  ;;  %v6451_v2 = vld [vmem:[#allocation10 + $0xf4] ss:$12 sps:$4 sm:$0xff]  }
 0x14e   : > { %2235 = vmatpush1.bf16.msra.mxu1 %v6275_v50  ;;  %2478 = vmatprep.subr.bf16.mxu0 %v6358_v3  ;;  %v6373_v50 = vld [vmem:[#allocation7 + $0x49c] ss:$48 sps:$4 sm:$0xff]   ;;  %v6386_v3 = vld [vmem:[#allocation7 + $0x5b8] ss:$48 sps:$4 sm:$0xff]  }
 0x14f   : > { %2236 = vmatprep.subr.bf16.mxu1 %v6283_v51  ;;  %v6425_v51 = vld [vmem:[#allocation10 + $0x90] ss:$12 sps:$4 sm:$0xff]  }
 0x151   : > { %2479 = vmatpush1.bf16.msra.mxu0 %v6356_v6  ;;  %v6457_v6 = vld [vmem:[#allocation10 + $0x10c] ss:$12 sps:$4 sm:$0xff]  }
 0x152   : > { %2237 = vmatpush1.bf16.msra.mxu1 %v6281_v54  ;;  %2480 = vmatprep.subr.bf16.mxu0 %v6364_v7  ;;  %v6379_v54 = vld [vmem:[#allocation7 + $0x4fc] ss:$48 sps:$4 sm:$0xff]   ;;  %v6392_v7 = vld [vmem:[#allocation7 + $0x618] ss:$48 sps:$4 sm:$0xff]  }
 0x153   : > { %2238 = vmatprep.subr.bf16.mxu1 %v6289_v55  ;;  %v6431_v55 = vld [vmem:[#allocation10 + $0xa8] ss:$12 sps:$4 sm:$0xff]  }
 0x155   : > { %2481 = vmatpush1.bf16.msra.mxu0 %v6362_v10  ;;  %v6463_v10 = vld [vmem:[#allocation10 + $0x124] ss:$12 sps:$4 sm:$0xff]  }
 0x156   : > { %2239 = vmatpush1.bf16.msra.mxu1 %v6287_v59  ;;  %2482 = vmatprep.subr.bf16.mxu0 %v6370_v11  ;;  %v6385_v59 = vld [vmem:[#allocation7 + $0x55c] ss:$48 sps:$4 sm:$0xff]   ;;  %v6398_v11 = vld [vmem:[#allocation7 + $0x678] ss:$48 sps:$4 sm:$0xff]  }
 0x157   : > { %2240 = vmatprep.subr.bf16.mxu1 %v6295_v60  ;;  %v6437_v60 = vld [vmem:[#allocation10 + $0xc0] ss:$12 sps:$4 sm:$0xff]  }
 0x159   : > { %2483 = vmatpush1.bf16.msra.mxu0 %v6368_v14  ;;  %v6469_v14 = vld [vmem:[#allocation10 + $0x13c] ss:$12 sps:$4 sm:$0xff]  }
 0x15a   : > { %2241 = vmatpush1.bf16.msra.mxu1 %v6293_v63  ;;  %2484 = vmatprep.subr.bf16.mxu0 %v6376_v15  ;;  %v6388_v63 = vld [vmem:[#allocation7 + $0x5bc] ss:$48 sps:$4 sm:$0xff]   ;;  %v6404_v15 = vld [vmem:[#allocation7 + $0x6d8] ss:$48 sps:$4 sm:$0xff]  }
 0x15b   : > { %2349 = vmatprep.subr.bf16.mxu1 %v6301_v1  ;;  %v6443_v1 = vld [vmem:[#allocation10 + $0xd8] ss:$12 sps:$4 sm:$0xff]  }
 0x15d   : > { %2259 = vmatmul.mubr.bf16.vlgmr.msra.gmra.mrb[4].mxu1 %v7377_v29  ;;  %2485 = vmatpush1.bf16.msra.mxu0 %v6374_v18  ;;  %v6475_v18 = vld [vmem:[#allocation10 + $0x154] ss:$12 sps:$4 sm:$0xff]  }
 0x15e   : > { %2350 = vmatpush1.bf16.msra.mxu1 %v6299_v4  ;;  %2381 = vmatprep.mubr.bf16.mxu1 %v7364_v20  ;;  %v6394_v4 = vld [vmem:[#allocation7 + $0x61c] ss:$48 sps:$4 sm:$0xff]  }
 0x15f   : > { %2351 = vmatprep.subr.bf16.mxu1 %v6307_v5  ;;  %2486 = vmatprep.subr.bf16.mxu0 %v6382_v19  ;;  %v6449_v5 = vld [vmem:[#allocation10 + $0xf0] ss:$12 sps:$4 sm:$0xff]  }
 0x160   : > { %v6410_v19 = vld [vmem:[#allocation7 + $0x738] ss:$48 sps:$4 sm:$0xff]  }
 0x161   : > { %2487 = vmatpush1.bf16.msra.mxu0 %v6380_v23  ;;  %v6481_v23 = vld [vmem:[#allocation10 + $0x16c] ss:$12 sps:$4 sm:$0xff]  }
 0x162   : > { %2352 = vmatpush1.bf16.msra.mxu1 %v6305_v8  ;;  %4556 = vmatprep.subr.bf16.mxu0 %v6391_v24  ;;  %v6400_v8 = vld [vmem:[#allocation7 + $0x67c] ss:$48 sps:$4 sm:$0xff]   ;;  %v6416_v24 = vld [vmem:[#allocation7 + $0x798] ss:$48 sps:$4 sm:$0xff]  }
 0x163   : > { %2353 = vmatprep.subr.bf16.mxu1 %v6313_v9  ;;  %v6455_v9 = vld [vmem:[#allocation10 + $0x108] ss:$12 sps:$4 sm:$0xff]  }
 0x164   : > { %2505 = vmatmul.mubr.bf16.vlgmr.msra.gmra.mrb[4].mxu0 %v7377_v29  ;;  %v6415_v29 = vld [vmem:[#allocation10 + $0x64] ss:$12 sps:$4 sm:$0xff]  }
 0x165   : > { %4557 = vmatpush1.bf16.msra.mxu0 %v6389_v27  ;;  %v6508_v27 = vld [vmem:[#allocation10 + $0x184] ss:$12 sps:$4 sm:$0xff]  }
 0x166   : > { %2354 = vmatpush1.bf16.msra.mxu1 %v6311_v12  ;;  %4558 = vmatprep.subr.bf16.mxu0 %v6397_v28  ;;  %v6406_v12 = vld [vmem:[#allocation7 + $0x6dc] ss:$48 sps:$4 sm:$0xff]   ;;  %v6422_v28 = vld [vmem:[#allocation7 + $0x7f8] ss:$48 sps:$4 sm:$0xff]  }
 0x167   : > { %2355 = vmatprep.subr.bf16.mxu1 %v6319_v13  ;;  %v6461_v13 = vld [vmem:[#allocation10 + $0x120] ss:$12 sps:$4 sm:$0xff]  }
 0x169   : > { %4559 = vmatpush1.bf16.msra.mxu0 %v6395_v32  ;;  %v6436_v32 = vld [vmem:[#allocation7 + $0x8bc] ss:$48 sps:$4 sm:$0xff]  }
 0x16a   : > { %2356 = vmatpush1.bf16.msra.mxu1 %v6317_v16  ;;  %4560 = vmatprep.subr.bf16.mxu0 %v6403_v33  ;;  %v6412_v16 = vld [vmem:[#allocation7 + $0x73c] ss:$48 sps:$4 sm:$0xff]   ;;  %v6434_v33 = vld [vmem:[#allocation7 + $0x8b8] ss:$48 sps:$4 sm:$0xff]  }
 0x16b   : > { %2357 = vmatprep.subr.bf16.mxu1 %v6325_v17  ;;  %v6467_v17 = vld [vmem:[#allocation10 + $0x138] ss:$12 sps:$4 sm:$0xff]  }
 0x16d   : > { %4561 = vmatpush1.bf16.msra.mxu0 %v6401_v36  ;;  %v6448_v36 = vld [vmem:[#allocation7 + $0x8c] ss:$48 sps:$4 sm:$0xff]  }
 0x16e   : > { %2358 = vmatpush1.bf16.msra.mxu1 %v6323_v21  ;;  %4562 = vmatprep.subr.bf16.mxu0 %v6409_v37  ;;  %v6418_v21 = vld [vmem:[#allocation7 + $0x79c] ss:$48 sps:$4 sm:$0xff]  }
 0x16f   : > { %2359 = vmatprep.subr.bf16.mxu1 %v6331_v22  ;;  %v6473_v22 = vld [vmem:[#allocation10 + $0x150] ss:$12 sps:$4 sm:$0xff]  }
 0x170   : > { %v7393_v37 = vld [vmem:[%s7345_s11 + $0x8] ss:$0 sps:$4 sm:$0xff]  }
 0x171   : > { %4563 = vmatpush1.bf16.msra.mxu0 %v6407_v40  ;;  %v592_v40 = vlaneseq }
 0x172   : > { %2360 = vmatpush1.bf16.msra.mxu1 %v6329_v25  ;;  %4564 = vmatprep.subr.bf16.mxu0 %v6415_v29  ;;  %v6424_v25 = vld [vmem:[#allocation7 + $0x7fc] ss:$48 sps:$4 sm:$0xff]   ;;  %v6452_v29 = vld [vmem:[#allocation7 + $0xe8] ss:$48 sps:$4 sm:$0xff]  }
 0x173   : > { %2361 = vmatprep.subr.bf16.mxu1 %v6337_v26  ;;  %v6479_v26 = vld [vmem:[#allocation10 + $0x168] ss:$12 sps:$4 sm:$0xff]  }
 0x175   : > { %4565 = vmatpush1.bf16.msra.mxu0 %v6413_v43  ;;  %v6458_v43 = vld [vmem:[#allocation7 + $0x148] ss:$48 sps:$4 sm:$0xff]  }
 0x176   : > { %2362 = vmatpush1.bf16.msra.mxu1 %v6335_v30  ;;  %4566 = vmatprep.subr.bf16.mxu0 %v6421_v44  ;;  %v6430_v30 = vld [vmem:[#allocation7 + $0x85c] ss:$48 sps:$4 sm:$0xff]  }
 0x177   : > { %2363 = vmatprep.subr.bf16.mxu1 %v6343_v31  ;;  %v6428_v31 = vld [vmem:[#allocation7 + $0x858] ss:$48 sps:$4 sm:$0xff]   ;;  %v6466_v44 = vld [vmem:[#allocation7 + $0x1ac] ss:$48 sps:$4 sm:$0xff]  }
 0x179   : > { %4567 = vmatpush1.bf16.msra.mxu0 %v6419_v47 }
 0x17a   : > { %2364 = vmatpush1.bf16.msra.mxu1 %v6341_v34  ;;  %4568 = vmatprep.subr.bf16.mxu0 %v6427_v48  ;;  %v6442_v34 = vld [vmem:[#allocation7 + $0x2c] ss:$48 sps:$4 sm:$0xff]  }
 0x17b   : > { %2365 = vmatprep.subr.bf16.mxu1 %v6349_v35  ;;  %v6440_v35 = vld [vmem:[#allocation7 + $0x28] ss:$48 sps:$4 sm:$0xff]   ;;  %v6472_v48 = vld [vmem:[#allocation7 + $0x20c] ss:$48 sps:$4 sm:$0xff]  }
 0x17d   : > { %4569 = vmatpush1.bf16.msra.mxu0 %v6425_v51 }
 0x17e   : > { %2366 = vmatpush1.bf16.msra.mxu1 %v6347_v38  ;;  %4570 = vmatprep.subr.bf16.mxu0 %v6433_v52  ;;  %v6446_v38 = vld [vmem:[#allocation7 + $0x88] ss:$48 sps:$4 sm:$0xff]   ;;  %v6478_v52 = vld [vmem:[#allocation7 + $0x26c] ss:$48 sps:$4 sm:$0xff]  }
 0x17f   : > { %2367 = vmatprep.subr.bf16.mxu1 %v6355_v39  ;;  %v6454_v39 = vld [vmem:[#allocation7 + $0xec] ss:$48 sps:$4 sm:$0xff]  }
 0x181   : > { %4571 = vmatpush1.bf16.msra.mxu0 %v6431_v55 }
 0x182   : > { %2368 = vmatpush1.bf16.msra.mxu1 %v6353_v41  ;;  %4572 = vmatprep.subr.bf16.mxu0 %v6439_v56  ;;  %v6460_v41 = vld [vmem:[#allocation7 + $0x14c] ss:$48 sps:$4 sm:$0xff]   ;;  %v6476_v56 = vld [vmem:[#allocation7 + $0x268] ss:$48 sps:$4 sm:$0xff]  }
 0x183   : > { %2369 = vmatprep.subr.bf16.mxu1 %v6361_v42  ;;  %v7397_v42 = vshrl.u32 %v592_v40, 7  ;;  %v6511_v40 = vld [vmem:[#allocation7 + $0x5cc] ss:$48 sps:$4 sm:$0xff]  }
 0x185   : > { %4573 = vmatpush1.bf16.msra.mxu0 %v6437_v60  ;;  %v7402_v47 = vsub.s32 0, %v7397_v42 }
 0x186   : > { %2370 = vmatpush1.bf16.msra.mxu1 %v6359_v45  ;;  %4574 = vmatprep.subr.bf16.mxu0 %v6445_v61  ;;  %v6464_v45 = vld [vmem:[#allocation7 + $0x1a8] ss:$48 sps:$4 sm:$0xff]  }
 0x187   : > { %2371 = vmatprep.subr.bf16.mxu1 %v6367_v46  ;;  %v7399_v46 = vld [vmem:[#allocation9] sm:$0xff] }
 0x189   : > { %4575 = vmatpush1.bf16.msra.mxu0 %v6443_v1  ;;  %v6482_v1 = vld [vmem:[#allocation7 + $0x2c8] ss:$48 sps:$4 sm:$0xff]  }
 0x18a   : > { %2372 = vmatpush1.bf16.msra.mxu1 %v6365_v49  ;;  %4576 = vmatprep.subr.bf16.mxu0 %v6451_v2  ;;  %v595_v49 = vrot.slane %v7399_v46, %v7402_v47  ;;  %v6506_v2 = vld [vmem:[#allocation10 + $0x180] ss:$12 sps:$4 sm:$0xff]  }
 0x18b   : > { %2373 = vmatprep.subr.bf16.mxu1 %v6373_v50  ;;  %v6470_v50 = vld [vmem:[#allocation7 + $0x208] ss:$48 sps:$4 sm:$0xff]  }
 0x18d   : > { %4577 = vmatpush1.bf16.msra.mxu0 %v6449_v5  ;;  %v6487_v5 = vld [vmem:[#allocation7 + $0x32c] ss:$48 sps:$4 sm:$0xff]  }
 0x18e   : > { %2374 = vmatpush1.bf16.msra.mxu1 %v6371_v53  ;;  %4578 = vmatprep.subr.bf16.mxu0 %v6457_v6  ;;  %v6514_v6 = vld [vmem:[#allocation10 + $0x19c] ss:$12 sps:$4 sm:$0xff]  }
 0x18f   : > { %2375 = vmatprep.subr.bf16.mxu1 %v6379_v54 }
 0x191   : > { %4579 = vmatpush1.bf16.msra.mxu0 %v6455_v9  ;;  %v6490_v9 = vld [vmem:[#allocation7 + $0x38c] ss:$48 sps:$4 sm:$0xff]  }
 0x192   : > { %2376 = vmatpush1.bf16.msra.mxu1 %v6377_v57  ;;  %4580 = vmatprep.subr.bf16.mxu0 %v6463_v10  ;;  %v6520_v10 = vld [vmem:[#allocation10 + $0x1b4] ss:$12 sps:$4 sm:$0xff]  }
 0x193   : > { %2377 = vmatprep.subr.bf16.mxu1 %v6385_v59 }
 0x195   : > { %4581 = vmatpush1.bf16.msra.mxu0 %v6461_v13  ;;  %v6493_v13 = vld [vmem:[#allocation7 + $0x3ec] ss:$48 sps:$4 sm:$0xff]  }
 0x196   : > { %2378 = vmatpush1.bf16.msra.mxu1 %v6383_v62  ;;  %4582 = vmatprep.subr.bf16.mxu0 %v6469_v14  ;;  %v6484_v62 = vld [vmem:[#allocation7 + $0x2cc] ss:$48 sps:$4 sm:$0xff]   ;;  %v6526_v14 = vld [vmem:[#allocation10 + $0x1cc] ss:$12 sps:$4 sm:$0xff]  }
 0x197   : > { %2379 = vmatprep.subr.bf16.mxu1 %v6388_v63 }
 0x199   : > { %4583 = vmatpush1.bf16.msra.mxu0 %v6467_v17  ;;  %v6496_v17 = vld [vmem:[#allocation7 + $0x44c] ss:$48 sps:$4 sm:$0xff]  }
 0x19a   : > { %2380 = vmatpush1.bf16.msra.mxu1 %v6386_v3  ;;  %4584 = vmatprep.subr.bf16.mxu0 %v6475_v18  ;;  %v6532_v18 = vld [vmem:[#allocation10 + $0x1e4] ss:$12 sps:$4 sm:$0xff]  }
 0x19b   : > { %2390 = vmatprep.subr.bf16.mxu1 %v6394_v4 }
 0x19d   : > { %2382 = vmatmul.mubr.bf16.vlgmr.msra.gmra.mrb[8].mxu1 %v7370_v58  ;;  %4585 = vmatpush1.bf16.msra.mxu0 %v6473_v22 }
 0x19e   : > { %2391 = vmatpush1.bf16.msra.mxu1 %v6392_v7  ;;  %2422 = vmatprep.mubr.bf16.mxu1 %v7098_v0  ;;  %v6485_v7 = vld [vmem:[#allocation7 + $0x328] ss:$48 sps:$4 sm:$0xff]  }
 0x19f   : > { %2392 = vmatprep.subr.bf16.mxu1 %v6400_v8  ;;  %4586 = vmatprep.subr.bf16.mxu0 %v6481_v23  ;;  %v6512_v8 = vld [vmem:[#allocation10 + $0x198] ss:$12 sps:$4 sm:$0xff]  }
 0x1a1   : > { %4587 = vmatpush1.bf16.msra.mxu0 %v6479_v26  ;;  %v6538_v26 = vld [vmem:[#allocation10 + $0x1fc] ss:$12 sps:$4 sm:$0xff]  }
 0x1a2   : > { %2393 = vmatpush1.bf16.msra.mxu1 %v6398_v11  ;;  %4597 = vmatprep.subr.bf16.mxu0 %v6508_v27  ;;  %v6488_v11 = vld [vmem:[#allocation7 + $0x388] ss:$48 sps:$4 sm:$0xff]  }
 0x1a3   : > { %2394 = vmatprep.subr.bf16.mxu1 %v6406_v12  ;;  %v6518_v12 = vld [vmem:[#allocation10 + $0x1b0] ss:$12 sps:$4 sm:$0xff]  }
 0x1a4   : > { %v6497_v27 = vld [vmem:[#allocation7 + $0x4a8] ss:$48 sps:$4 sm:$0xff]  }
 0x1a6   : > { %2395 = vmatpush1.bf16.msra.mxu1 %v6404_v15  ;;  %v6491_v15 = vld [vmem:[#allocation7 + $0x3e8] ss:$48 sps:$4 sm:$0xff]  }
 0x1a7   : > { %2396 = vmatprep.subr.bf16.mxu1 %v6412_v16  ;;  %v6524_v16 = vld [vmem:[#allocation10 + $0x1c8] ss:$12 sps:$4 sm:$0xff]  }
 0x1aa   : > { %2397 = vmatpush1.bf16.msra.mxu1 %v6410_v19  ;;  %v6494_v19 = vld [vmem:[#allocation7 + $0x448] ss:$48 sps:$4 sm:$0xff]  }
 0x1ab   : > { %2398 = vmatprep.subr.bf16.mxu1 %v6418_v21  ;;  %v6530_v21 = vld [vmem:[#allocation10 + $0x1e0] ss:$12 sps:$4 sm:$0xff]  }
 0x1ae   : > { %2399 = vmatpush1.bf16.msra.mxu1 %v6416_v24  ;;  %v6499_v24 = vld [vmem:[#allocation7 + $0x4ac] ss:$48 sps:$4 sm:$0xff]  }
 0x1af   : > { %2400 = vmatprep.subr.bf16.mxu1 %v6424_v25 }
 0x1b2   : > { %2401 = vmatpush1.bf16.msra.mxu1 %v6422_v28 }
 0x1b3   : > { %2402 = vmatprep.subr.bf16.mxu1 %v6430_v30  ;;  %v6536_v30 = vld [vmem:[#allocation10 + $0x1f8] ss:$12 sps:$4 sm:$0xff]  }
 0x1b6   : > { %2403 = vmatpush1.bf16.msra.mxu1 %v6428_v31  ;;  %v6502_v31 = vld [vmem:[#allocation7 + $0x50c] ss:$48 sps:$4 sm:$0xff]  }
 0x1b7   : > { %2404 = vmatprep.subr.bf16.mxu1 %v6436_v32  ;;  %v6544_v32 = vld [vmem:[#allocation10 + $0x214] ss:$12 sps:$4 sm:$0xff]  }
 0x1ba   : > { %2405 = vmatpush1.bf16.msra.mxu1 %v6434_v33  ;;  %v6500_v33 = vld [vmem:[#allocation7 + $0x508] ss:$48 sps:$4 sm:$0xff]  }
 0x1bb   : > { %2513 = vmatprep.subr.bf16.mxu1 %v6442_v34  ;;  %v6542_v34 = vld [vmem:[#allocation10 + $0x210] ss:$12 sps:$4 sm:$0xff]  }
 0x1bd   : > { %2423 = vmatmul.mubr.bf16.vlgmr.msra.gmra.mrb[8].mxu1 %v7393_v37 }
 0x1be   : > { %2514 = vmatpush1.bf16.msra.mxu1 %v6440_v35  ;;  %2545 = vmatprep.mubr.bf16.mxu1 %v7364_v20  ;;  %v7405_v20 = vsub.s32 1, %v7397_v42  ;;  %v6505_v35 = vld [vmem:[#allocation7 + $0x56c] ss:$48 sps:$4 sm:$0xff]  }
 0x1bf   : > { %2515 = vmatprep.subr.bf16.mxu1 %v6448_v36  ;;  %v6550_v36 = vld [vmem:[#allocation10 + $0x22c] ss:$12 sps:$4 sm:$0xff]  }
 0x1c0   : > { %v599_v51 = vrot.slane %v7399_v46, %v7405_v20 }
 0x1c2   : > { %2516 = vmatpush1.bf16.msra.mxu1 %v6446_v38  ;;  %v6503_v38 = vld [vmem:[#allocation7 + $0x568] ss:$48 sps:$4 sm:$0xff]  }
 0x1c3   : > { %2517 = vmatprep.subr.bf16.mxu1 %v6454_v39  ;;  %v6548_v39 = vld [vmem:[#allocation10 + $0x228] ss:$12 sps:$4 sm:$0xff]  }
 0x1c6   : > { %2518 = vmatpush1.bf16.msra.mxu1 %v6452_v29  ;;  %v6556_v29 = vld [vmem:[#allocation10 + $0x244] ss:$12 sps:$4 sm:$0xff]  }
 0x1c7   : > { %2519 = vmatprep.subr.bf16.mxu1 %v6460_v41  ;;  %v6509_v41 = vld [vmem:[#allocation7 + $0x5c8] ss:$48 sps:$4 sm:$0xff]  }
 0x1ca   : > { %2520 = vmatpush1.bf16.msra.mxu1 %v6458_v43  ;;  %v6517_v43 = vld [vmem:[#allocation7 + $0x62c] ss:$48 sps:$4 sm:$0xff]  }
 0x1cb   : > { %2521 = vmatprep.subr.bf16.mxu1 %v6466_v44  ;;  %v6554_v44 = vld [vmem:[#allocation10 + $0x240] ss:$12 sps:$4 sm:$0xff]  }
 0x1ce   : > { %2522 = vmatpush1.bf16.msra.mxu1 %v6464_v45  ;;  %v6562_v45 = vld [vmem:[#allocation10 + $0x25c] ss:$12 sps:$4 sm:$0xff]  }
 0x1cf   : > { %2523 = vmatprep.subr.bf16.mxu1 %v6472_v48  ;;  %v6515_v48 = vld [vmem:[#allocation7 + $0x628] ss:$48 sps:$4 sm:$0xff]  }
 0x1d0   : > { %v2178_v53 = vpop.f32.mrb[0].mxu1 }
 0x1d1   : > { %v5895_v54 = vadd.f32 %v2178_v53, %v595_v49  ;;  %v2180_v55 = vpop.f32.mrb[1].mxu1  ;;  %v6523_v49 = vld [vmem:[#allocation7 + $0x68c] ss:$48 sps:$4 sm:$0xff]  }
 0x1d2   : > { %v5896_v57 = vadd.f32 %v2180_v55, %v599_v51  ;;  %v2182_v59 = vpop.f32.mrb[2].mxu1  ;;  %2524 = vmatpush1.bf16.msra.mxu1 %v6470_v50  ;;  %v6560_v50 = vld [vmem:[#allocation10 + $0x258] ss:$12 sps:$4 sm:$0xff]   ;;  %v6567_v51 = vld [vmem:[#allocation10 + $0x274] ss:$12 sps:$4 sm:$0xff]  }
 0x1d3   : > { %v2595_v60 = vmax.f32 %v5895_v54, 0.0  ;;  %v2183_v61 = vpop.f32.mrb[3].mxu1  ;;  %2525 = vmatprep.subr.bf16.mxu1 %v6478_v52  ;;  %v6521_v52 = vld [vmem:[#allocation7 + $0x688] ss:$48 sps:$4 sm:$0xff]   ;;  %v6529_v53 = vld [vmem:[#allocation7 + $0x6ec] ss:$48 sps:$4 sm:$0xff]  }
 0x1d4   : > { %v2596_v63 = vmax.f32 %v5896_v57, 0.0  ;;  %v6565_v54 = vld [vmem:[#allocation10 + $0x270] ss:$12 sps:$4 sm:$0xff]   ;;  %v6572_v55 = vld [vmem:[#allocation10 + $0x28c] ss:$12 sps:$4 sm:$0xff]  }
 0x1d5   : > { %v7413_v4 = vpack.c.bf16 %v2595_v60, %v2595_v60  ;;  %v6535_v57 = vld [vmem:[#allocation7 + $0x74c] ss:$48 sps:$4 sm:$0xff]   ;;  %v6570_v59 = vld [vmem:[#allocation10 + $0x288] ss:$12 sps:$4 sm:$0xff]   ;;  %v6533_v61 = vld [vmem:[#allocation7 + $0x748] ss:$48 sps:$4 sm:$0xff]  }
 0x1d6   : > { %v7411_v3 = vpack.c.bf16 %v2596_v63, %v2596_v63  ;;  %2526 = vmatpush1.bf16.msra.mxu1 %v6476_v56  ;;  %v6527_v56 = vld [vmem:[#allocation7 + $0x6e8] ss:$48 sps:$4 sm:$0xff]   ;;  %v6577_v60 = vld [vmem:[#allocation10 + $0x2a4] ss:$12 sps:$4 sm:$0xff]  }
 0x1d7   : > { %2527 = vmatprep.subr.bf16.mxu1 %v6484_v62  ;;  %v7417_v22 = vpop.f32.mrb[0].mxu0  ;;  %v6582_v62 = vld [vmem:[#allocation10 + $0x2bc] ss:$12 sps:$4 sm:$0xff]  }
 0x1d8   : > { %4588 = vmatprep.mubr.bf16.mxu0 %v7411_v3  ;;  %v7419_v23 = vpop.f32.mrb[1].mxu0  ;;  %v6539_v63 = vld [vmem:[#allocation7 + $0x7a8] ss:$48 sps:$4 sm:$0xff]  }
 0x1d9   : > { %4589 = vmatmul.mubr.bf16.vlgmr.msra.gmra.mrb[8].mxu0 %v7413_v4  ;;  %v2346_v25 = vpop.f32.mrb[2].mxu0 }
 0x1da   : > { %2528 = vmatpush1.bf16.msra.mxu1 %v6482_v1  ;;  %4598 = vmatpush1.bf16.msra.mxu0 %v6506_v2  ;;  %v2347_v28 = vpop.f32.mrb[3].mxu0  ;;  %v6547_v1 = vld [vmem:[#allocation7 + $0x80c] ss:$48 sps:$4 sm:$0xff]   ;;  %v6580_v2 = vld [vmem:[#allocation10 + $0x2b8] ss:$12 sps:$4 sm:$0xff]  }
 0x1db   : > { %2529 = vmatprep.subr.bf16.mxu1 %v6487_v5  ;;  %4599 = vmatprep.subr.bf16.mxu0 %v6514_v6  ;;  %v6545_v5 = vld [vmem:[#allocation7 + $0x808] ss:$48 sps:$4 sm:$0xff]   ;;  %v6587_v6 = vld [vmem:[#allocation10 + $0x2d4] ss:$12 sps:$4 sm:$0xff]   ;;  %v7427_v28 = vsub.s32 2, %v7397_v42 }
 0x1dc   : > { %v6579_v25 = vld [vmem:[#allocation10 + $0x50] ss:$12 sps:$4 sm:$0xff]  }
 0x1de   : > { %2530 = vmatpush1.bf16.msra.mxu1 %v6485_v7  ;;  %4600 = vmatpush1.bf16.msra.mxu0 %v6512_v8  ;;  %v6553_v7 = vld [vmem:[#allocation7 + $0x86c] ss:$48 sps:$4 sm:$0xff]  }
 0x1df   : > { %2531 = vmatprep.subr.bf16.mxu1 %v6490_v9  ;;  %4601 = vmatprep.subr.bf16.mxu0 %v6520_v10  ;;  %v6585_v8 = vld [vmem:[#allocation10 + $0x2d0] ss:$12 sps:$4 sm:$0xff]   ;;  %v6592_v10 = vld [vmem:[#allocation10 + $0x2ec] ss:$12 sps:$4 sm:$0xff]  }
 0x1e0   : > { %v6551_v9 = vld [vmem:[#allocation7 + $0x868] ss:$48 sps:$4 sm:$0xff]  }
 0x1e2   : > { %2532 = vmatpush1.bf16.msra.mxu1 %v6488_v11  ;;  %4602 = vmatpush1.bf16.msra.mxu0 %v6518_v12  ;;  %v6559_v11 = vld [vmem:[#allocation7 + $0x8cc] ss:$48 sps:$4 sm:$0xff]   ;;  %v6590_v12 = vld [vmem:[#allocation10 + $0x2e8] ss:$12 sps:$4 sm:$0xff]  }
 0x1e3   : > { %2533 = vmatprep.subr.bf16.mxu1 %v6493_v13  ;;  %4603 = vmatprep.subr.bf16.mxu0 %v6526_v14  ;;  %v6597_v13 = vld [vmem:[#allocation10 + $0x304] ss:$12 sps:$4 sm:$0xff]   ;;  %v6557_v14 = vld [vmem:[#allocation7 + $0x8c8] ss:$48 sps:$4 sm:$0xff]  }
 0x1e6   : > { %2534 = vmatpush1.bf16.msra.mxu1 %v6491_v15  ;;  %4604 = vmatpush1.bf16.msra.mxu0 %v6524_v16  ;;  %v6563_v15 = vld [vmem:[#allocation10 + $0xc8] ss:$12 sps:$4 sm:$0xff]  }
 0x1e7   : > { %2535 = vmatprep.subr.bf16.mxu1 %v6496_v17  ;;  %4605 = vmatprep.subr.bf16.mxu0 %v6532_v18  ;;  %v6564_v16 = vld [vmem:[#allocation10 + $0x8] ss:$12 sps:$4 sm:$0xff]   ;;  %v6568_v17 = vld [vmem:[#allocation10 + $0xe0] ss:$12 sps:$4 sm:$0xff]  }
 0x1e8   : > { %v6569_v18 = vld [vmem:[#allocation10 + $0x20] ss:$12 sps:$4 sm:$0xff]  }
 0x1ea   : > { %2536 = vmatpush1.bf16.msra.mxu1 %v6494_v19  ;;  %4606 = vmatpush1.bf16.msra.mxu0 %v6530_v21  ;;  %v6573_v19 = vld [vmem:[#allocation10 + $0xf8] ss:$12 sps:$4 sm:$0xff]  }
 0x1eb   : > { %2537 = vmatprep.subr.bf16.mxu1 %v6499_v24  ;;  %4607 = vmatprep.subr.bf16.mxu0 %v6538_v26  ;;  %v6574_v21 = vld [vmem:[#allocation10 + $0x38] ss:$12 sps:$4 sm:$0xff]   ;;  %v6578_v24 = vld [vmem:[#allocation10 + $0x110] ss:$12 sps:$4 sm:$0xff]   ;;  %v6583_v26 = vld [vmem:[#allocation10 + $0x128] ss:$12 sps:$4 sm:$0xff]  }
 0x1ee   : > { %2538 = vmatpush1.bf16.msra.mxu1 %v6497_v27  ;;  %4608 = vmatpush1.bf16.msra.mxu0 %v6536_v30  ;;  %v614_v27 = vsub.s32 5, %v7397_v42  ;;  %v6588_v30 = vld [vmem:[#allocation10 + $0x140] ss:$12 sps:$4 sm:$0xff]  }
 0x1ef   : > { %2539 = vmatprep.subr.bf16.mxu1 %v6502_v31  ;;  %4609 = vmatprep.subr.bf16.mxu0 %v6544_v32  ;;  %v603_v32 = vrot.slane %v7399_v46, %v7427_v28 }
 0x1f0   : > { %v615_v31 = vrot.slane %v7399_v46, %v614_v27  ;;  %v6637_v27 = vld [vmem:[#allocation10 + $0x3c4] ss:$12 sps:$4 sm:$0xff]  }
 0x1f2   : > { %2540 = vmatpush1.bf16.msra.mxu1 %v6500_v33  ;;  %4610 = vmatpush1.bf16.msra.mxu0 %v6542_v34  ;;  %v6589_v34 = vld [vmem:[#allocation10 + $0x80] ss:$12 sps:$4 sm:$0xff]  }
 0x1f3   : > { %2541 = vmatprep.subr.bf16.mxu1 %v6505_v35  ;;  %4611 = vmatprep.subr.bf16.mxu0 %v6550_v36  ;;  %v6593_v35 = vld [vmem:[#allocation10 + $0x158] ss:$12 sps:$4 sm:$0xff]   ;;  %v5900_v36 = vadd.f32 %v7419_v23, %v615_v31  ;;  %v6599_v23 = vld [vmem:[#allocation10 + $0xb0] ss:$12 sps:$4 sm:$0xff]  }
 0x1f4   : > { %v6639_v31 = vld [vmem:[#allocation10 + $0x230] ss:$12 sps:$4 sm:$0xff]  }
 0x1f6   : > { %2542 = vmatpush1.bf16.msra.mxu1 %v6503_v38  ;;  %4612 = vmatpush1.bf16.msra.mxu0 %v6548_v39 }
 0x1f7   : > { %2543 = vmatprep.subr.bf16.mxu1 %v6511_v40  ;;  %4613 = vmatprep.subr.bf16.mxu0 %v6556_v29 }
 0x1fa   : > { %2544 = vmatpush1.bf16.msra.mxu1 %v6509_v41  ;;  %4614 = vmatpush1.bf16.msra.mxu0 %v6554_v44 }
 0x1fb   : > { %2554 = vmatprep.subr.bf16.mxu1 %v6517_v43  ;;  %4615 = vmatprep.subr.bf16.mxu0 %v6562_v45  ;;  %v6594_v43 = vld [vmem:[#allocation10 + $0x98] ss:$12 sps:$4 sm:$0xff]  }
 0x1fd   : > { %2546 = vmatmul.mubr.bf16.vlgmr.msra.gmra.mrb[12].mxu1 %v7370_v58  ;;  %v6541_v58 = vld [vmem:[#allocation7 + $0x7ac] ss:$48 sps:$4 sm:$0xff]  }
 0x1fe   : > { %2555 = vmatpush1.bf16.msra.mxu1 %v6515_v48  ;;  %2586 = vmatprep.mubr.bf16.mxu1 %v7098_v0  ;;  %v6575_v0 = vld [vmem:[#allocation10 + $0x2a0] ss:$12 sps:$4 sm:$0xff]   ;;  %v6598_v48 = vld [vmem:[#allocation10 + $0x170] ss:$12 sps:$4 sm:$0xff]  }
 0x1ff   : > { %2556 = vmatprep.subr.bf16.mxu1 %v6523_v49  ;;  %4616 = vmatpush1.bf16.msra.mxu0 %v6560_v50  ;;  %v2600_v49 = vmax.f32 %v5900_v36, 0.0  ;;  %v6647_v36 = vld [vmem:[#allocation10 + $0x3f4] ss:$12 sps:$4 sm:$0xff]  }
 0x200   : > { %4617 = vmatprep.subr.bf16.mxu0 %v6567_v51 }
 0x202   : > { %2557 = vmatpush1.bf16.msra.mxu1 %v6521_v52  ;;  %v6595_v52 = vld [vmem:[#allocation10 + $0x300] ss:$12 sps:$4 sm:$0xff]  }
 0x203   : > { %2558 = vmatprep.subr.bf16.mxu1 %v6529_v53  ;;  %4618 = vmatpush1.bf16.msra.mxu0 %v6565_v54  ;;  %v6602_v54 = vld [vmem:[#allocation10 + $0x31c] ss:$12 sps:$4 sm:$0xff]  }
 0x204   : > { %4619 = vmatprep.subr.bf16.mxu0 %v6572_v55  ;;  %v7439_v55 = vpack.c.bf16 %v2600_v49, %v2600_v49  ;;  %v6655_v49 = vld [vmem:[#allocation10 + $0x420] ss:$12 sps:$4 sm:$0xff]  }
 0x206   : > { %2559 = vmatpush1.bf16.msra.mxu1 %v6527_v56  ;;  %v6603_v56 = vld [vmem:[#allocation10 + $0x248] ss:$12 sps:$4 sm:$0xff]  }
 0x207   : > { %2560 = vmatprep.subr.bf16.mxu1 %v6535_v57  ;;  %4620 = vmatpush1.bf16.msra.mxu0 %v6570_v59  ;;  %v6600_v57 = vld [vmem:[#allocation10 + $0x318] ss:$12 sps:$4 sm:$0xff]   ;;  %v6604_v59 = vld [vmem:[#allocation10 + $0x188] ss:$12 sps:$4 sm:$0xff]  }
 0x208   : > { %4621 = vmatprep.subr.bf16.mxu0 %v6577_v60  ;;  %v6607_v60 = vld [vmem:[#allocation10 + $0x334] ss:$12 sps:$4 sm:$0xff]  }
 0x20a   : > { %2561 = vmatpush1.bf16.msra.mxu1 %v6533_v61  ;;  %v6608_v61 = vld [vmem:[#allocation10 + $0x260] ss:$12 sps:$4 sm:$0xff]  }
 0x20b   : > { %2562 = vmatprep.subr.bf16.mxu1 %v6541_v58  ;;  %4622 = vmatpush1.bf16.msra.mxu0 %v6575_v0  ;;  %v6605_v58 = vld [vmem:[#allocation10 + $0x330] ss:$12 sps:$4 sm:$0xff]   ;;  %v6609_v0 = vld [vmem:[#allocation10 + $0x1a0] ss:$12 sps:$4 sm:$0xff]  }
 0x20c   : > { %4623 = vmatprep.subr.bf16.mxu0 %v6582_v62  ;;  %v6612_v62 = vld [vmem:[#allocation10 + $0x34c] ss:$12 sps:$4 sm:$0xff]  }
 0x20e   : > { %2563 = vmatpush1.bf16.msra.mxu1 %v6539_v63  ;;  %v6613_v63 = vld [vmem:[#allocation10 + $0x278] ss:$12 sps:$4 sm:$0xff]  }
 0x20f   : > { %2564 = vmatprep.subr.bf16.mxu1 %v6547_v1  ;;  %4624 = vmatpush1.bf16.msra.mxu0 %v6580_v2  ;;  %v6610_v1 = vld [vmem:[#allocation10 + $0x348] ss:$12 sps:$4 sm:$0xff]   ;;  %v6614_v2 = vld [vmem:[#allocation10 + $0x1b8] ss:$12 sps:$4 sm:$0xff]  }
 0x210   : > { %4625 = vmatprep.subr.bf16.mxu0 %v6587_v6  ;;  %v6618_v6 = vld [vmem:[#allocation10 + $0x290] ss:$12 sps:$4 sm:$0xff]  }
 0x212   : > { %2565 = vmatpush1.bf16.msra.mxu1 %v6545_v5  ;;  %v6617_v5 = vld [vmem:[#allocation10 + $0x364] ss:$12 sps:$4 sm:$0xff]  }
 0x213   : > { %2566 = vmatprep.subr.bf16.mxu1 %v6553_v7  ;;  %4626 = vmatpush1.bf16.msra.mxu0 %v6585_v8 }
 0x214   : > { %4627 = vmatprep.subr.bf16.mxu0 %v6592_v10  ;;  %v6622_v10 = vld [vmem:[#allocation10 + $0x37c] ss:$12 sps:$4 sm:$0xff]  }
 0x216   : > { %2567 = vmatpush1.bf16.msra.mxu1 %v6551_v9  ;;  %v6619_v9 = vld [vmem:[#allocation10 + $0x1d0] ss:$12 sps:$4 sm:$0xff]  }
 0x217   : > { %2568 = vmatprep.subr.bf16.mxu1 %v6559_v11  ;;  %4628 = vmatpush1.bf16.msra.mxu0 %v6590_v12  ;;  %v6623_v12 = vld [vmem:[#allocation10 + $0x2a8] ss:$12 sps:$4 sm:$0xff]  }
 0x218   : > { %4638 = vmatprep.subr.bf16.mxu0 %v6597_v13 }
 0x21a   : > { %2569 = vmatpush1.bf16.msra.mxu1 %v6557_v14  ;;  %v6620_v14 = vld [vmem:[#allocation10 + $0x378] ss:$12 sps:$4 sm:$0xff]  }
 0x21b   : > { %5763 = vmatprep.subr.bf16.mxu1 %v6563_v15  ;;  %v6624_v15 = vld [vmem:[#allocation10 + $0x1e8] ss:$12 sps:$4 sm:$0xff]  }
 0x21d   : > { %2587 = vmatmul.mubr.bf16.vlgmr.msra.gmra.mrb[12].mxu1 %v7393_v37  ;;  %v6584_v37 = vld [vmem:[#allocation10 + $0x68] ss:$12 sps:$4 sm:$0xff]  }
 0x21e   : > { %5764 = vmatpush3.bf16.msra.mxu1 %v6564_v16  ;;  %4834 = vmatprep.mubr.bf16.mxu1 %v7411_v3  ;;  %v606_v3 = vsub.s32 3, %v7397_v42  ;;  %v6627_v16 = vld [vmem:[#allocation10 + $0x394] ss:$12 sps:$4 sm:$0xff]  }
 0x21f   : > { %5765 = vmatprep.subr.bf16.mxu1 %v6568_v17  ;;  %v6628_v17 = vld [vmem:[#allocation10 + $0x2c0] ss:$12 sps:$4 sm:$0xff]  }
 0x220   : > { %v607_v33 = vrot.slane %v7399_v46, %v606_v3 }
 0x222   : > { %5766 = vmatpush3.bf16.msra.mxu1 %v6569_v18  ;;  %v6625_v18 = vld [vmem:[#allocation10 + $0x390] ss:$12 sps:$4 sm:$0xff]  }
 0x223   : > { %5767 = vmatprep.subr.bf16.mxu1 %v6573_v19  ;;  %v6629_v19 = vld [vmem:[#allocation10 + $0x200] ss:$12 sps:$4 sm:$0xff]  }
 0x226   : > { %5768 = vmatpush3.bf16.msra.mxu1 %v6574_v21  ;;  %v6632_v21 = vld [vmem:[#allocation10 + $0x3ac] ss:$12 sps:$4 sm:$0xff]  }
 0x227   : > { %5769 = vmatprep.subr.bf16.mxu1 %v6578_v24  ;;  %v6633_v24 = vld [vmem:[#allocation10 + $0x2d8] ss:$12 sps:$4 sm:$0xff]  }
 0x22a   : > { %5770 = vmatpush3.bf16.msra.mxu1 %v6579_v25  ;;  %v6630_v25 = vld [vmem:[#allocation10 + $0x3a8] ss:$12 sps:$4 sm:$0xff]  }
 0x22b   : > { %5771 = vmatprep.subr.bf16.mxu1 %v6583_v26  ;;  %v6634_v26 = vld [vmem:[#allocation10 + $0x218] ss:$12 sps:$4 sm:$0xff]  }
 0x22e   : > { %5772 = vmatpush3.bf16.msra.mxu1 %v6584_v37  ;;  %v6638_v37 = vld [vmem:[#allocation10 + $0x2f0] ss:$12 sps:$4 sm:$0xff]  }
 0x22f   : > { %5773 = vmatprep.subr.bf16.mxu1 %v6588_v30  ;;  %v6635_v30 = vld [vmem:[#allocation10 + $0x3c0] ss:$12 sps:$4 sm:$0xff]  }
 0x230   : > { %v2260_v38 = vpop.f32.mrb[4].mxu1 }
 0x231   : > { %v5897_v39 = vadd.f32 %v2260_v38, %v603_v32  ;;  %v2262_v40 = vpop.f32.mrb[5].mxu1  ;;  %v6642_v32 = vld [vmem:[#allocation10 + $0x3dc] ss:$12 sps:$4 sm:$0xff]   ;;  %v6648_v38 = vld [vmem:[#allocation10 + $0x3e0] ss:$12 sps:$4 sm:$0xff]  }
 0x232   : > { %v5898_v29 = vadd.f32 %v2262_v40, %v607_v33  ;;  %v2264_v41 = vpop.f32.mrb[6].mxu1  ;;  %5774 = vmatpush3.bf16.msra.mxu1 %v6589_v34  ;;  %v6643_v33 = vld [vmem:[#allocation10 + $0x3c8] ss:$12 sps:$4 sm:$0xff]   ;;  %v6640_v34 = vld [vmem:[#allocation10 + $0x3d8] ss:$12 sps:$4 sm:$0xff]  }
 0x233   : > { %v2597_v44 = vmax.f32 %v5897_v39, 0.0  ;;  %v2265_v45 = vpop.f32.mrb[7].mxu1  ;;  %5775 = vmatprep.subr.bf16.mxu1 %v6593_v35  ;;  %v6644_v35 = vld [vmem:[#allocation10 + $0x308] ss:$12 sps:$4 sm:$0xff]   ;;  %v6645_v39 = vld [vmem:[#allocation10 + $0x3f0] ss:$12 sps:$4 sm:$0xff]  }
 0x234   : > { %v2598_v50 = vmax.f32 %v5898_v29, 0.0  ;;  %v6649_v40 = vld [vmem:[#allocation10 + $0x320] ss:$12 sps:$4 sm:$0xff]   ;;  %v6653_v41 = vld [vmem:[#allocation10 + $0x3f8] ss:$12 sps:$4 sm:$0xff]  }
 0x235   : > { %v7437_v53 = vpack.c.bf16 %v2597_v44, %v2597_v44  ;;  %v6652_v29 = vld [vmem:[#allocation10 + $0x40c] ss:$12 sps:$4 sm:$0xff]   ;;  %v6657_v45 = vld [vmem:[#allocation10 + $0x424] ss:$12 sps:$4 sm:$0xff]  }
 0x236   : > { %v2610_v51 = vpack.c.bf16 %v2598_v50, %v2598_v50  ;;  %5776 = vmatpush3.bf16.msra.mxu1 %v6594_v43  ;;  %v6650_v43 = vld [vmem:[#allocation10 + $0x408] ss:$12 sps:$4 sm:$0xff]   ;;  %v6654_v44 = vld [vmem:[#allocation10 + $0x338] ss:$12 sps:$4 sm:$0xff]   ;;  %v610_v50 = vsub.s32 4, %v7397_v42 }
 0x237   : > { %5777 = vmatprep.subr.bf16.mxu1 %v6598_v48  ;;  %v7444_v7 = vpop.f32.mrb[4].mxu0  ;;  %v6658_v48 = vld [vmem:[#allocation10 + $0x410] ss:$12 sps:$4 sm:$0xff]  }
 0x238   : > { %4629 = vmatprep.mubr.bf16.mxu0 %v2610_v51  ;;  %v7446_v8 = vpop.f32.mrb[5].mxu0 }
 0x239   : > { %4630 = vmatmul.mubr.bf16.vlgmr.msra.gmra.mrb[8].mxu0 %v7437_v53  ;;  %v2510_v11 = vpop.f32.mrb[6].mxu0 }
 0x23a   : > { %4639 = vmatpush1.bf16.msra.mxu0 %v6595_v52  ;;  %4670 = vmatprep.mubr.bf16.mxu0 %v7439_v55  ;;  %v2511_v13 = vpop.f32.mrb[7].mxu0  ;;  %v6662_v52 = vld [vmem:[#allocation10 + $0x43c] ss:$12 sps:$4 sm:$0xff]  }
 0x23b   : > { %5778 = vmatpush3.bf16.msra.mxu1 %v6599_v23  ;;  %4640 = vmatprep.subr.bf16.mxu0 %v6602_v54  ;;  %v6660_v23 = vld [vmem:[#allocation10 + $0x438] ss:$12 sps:$4 sm:$0xff]   ;;  %v611_v54 = vrot.slane %v7399_v46, %v610_v50  ;;  %v6684_v11 = vld [vmem:[#allocation10 + $0x488] ss:$12 sps:$4 sm:$0xff]   ;;  %v6688_v13 = vld [vmem:[#allocation10 + $0x560] ss:$12 sps:$4 sm:$0xff]  }
 0x23c   : > { %5785 = vmatprep.subr.bf16.mxu1 %v6603_v56  ;;  %v6667_v56 = vld [vmem:[#allocation10 + $0x454] ss:$12 sps:$4 sm:$0xff]   ;;  %v6674_v46 = vld [vmem:[#allocation10 + $0x398] ss:$12 sps:$4 sm:$0xff]  }
 0x23e   : > { %4641 = vmatpush1.bf16.msra.mxu0 %v6600_v57  ;;  %4835 = vmatmul.mubr.bf16.vlgmr.msra.gmra.mrb[16].mxu1 %v7413_v4  ;;  %v6615_v4 = vld [vmem:[#allocation10 + $0x360] ss:$12 sps:$4 sm:$0xff]  }
 0x23f   : > { %5786 = vmatpush3.bf16.msra.mxu1 %v6604_v59  ;;  %4874 = vmatprep.mubr.bf16.mxu1 %v2610_v51  ;;  %v6659_v51 = vld [vmem:[#allocation10 + $0x350] ss:$12 sps:$4 sm:$0xff]   ;;  %v6668_v57 = vld [vmem:[#allocation10 + $0x440] ss:$12 sps:$4 sm:$0xff]  }
 0x240   : > { %4642 = vmatprep.subr.bf16.mxu0 %v6607_v60  ;;  %5787 = vmatprep.subr.bf16.mxu1 %v6608_v61  ;;  %v6665_v59 = vld [vmem:[#allocation10 + $0x450] ss:$12 sps:$4 sm:$0xff]   ;;  %v5899_v60 = vadd.f32 %v7417_v22, %v611_v54  ;;  %v6669_v61 = vld [vmem:[#allocation10 + $0x380] ss:$12 sps:$4 sm:$0xff]  }
 0x241   : > { %v6679_v22 = vld [vmem:[#allocation10 + $0x3b0] ss:$12 sps:$4 sm:$0xff]  }
 0x242   : > { %4643 = vmatpush1.bf16.msra.mxu0 %v6605_v58  ;;  %v6672_v58 = vld [vmem:[#allocation10 + $0x46c] ss:$12 sps:$4 sm:$0xff]   ;;  %v6717_v54 = vld [vmem:[#allocation10 + $0x544] ss:$12 sps:$4 sm:$0xff]  }
 0x243   : > { %5788 = vmatpush3.bf16.msra.mxu1 %v6609_v0  ;;  %4644 = vmatprep.subr.bf16.mxu0 %v6612_v62  ;;  %v6673_v0 = vld [vmem:[#allocation10 + $0x458] ss:$12 sps:$4 sm:$0xff]   ;;  %v6670_v62 = vld [vmem:[#allocation10 + $0x468] ss:$12 sps:$4 sm:$0xff]  }
 0x244   : > { %5789 = vmatprep.subr.bf16.mxu1 %v6613_v63  ;;  %v2599_v63 = vmax.f32 %v5899_v60, 0.0 }
 0x246   : > { %4645 = vmatpush1.bf16.msra.mxu0 %v6610_v1  ;;  %v6677_v1 = vld [vmem:[#allocation10 + $0x484] ss:$12 sps:$4 sm:$0xff]  }
 0x247   : > { %5790 = vmatpush3.bf16.msra.mxu1 %v6614_v2  ;;  %4646 = vmatprep.subr.bf16.mxu0 %v6617_v5  ;;  %v6678_v2 = vld [vmem:[#allocation10 + $0x470] ss:$12 sps:$4 sm:$0xff]   ;;  %v6675_v5 = vld [vmem:[#allocation10 + $0x480] ss:$12 sps:$4 sm:$0xff]  }
 0x248   : > { %5791 = vmatprep.subr.bf16.mxu1 %v6618_v6  ;;  %v2611_v6 = vpack.c.bf16 %v2599_v63, %v2599_v63  ;;  %v6723_v63 = vld [vmem:[#allocation10 + $0x6c8] ss:$12 sps:$4 sm:$0xff]  }
 0x24a   : > { %4647 = vmatpush1.bf16.msra.mxu0 %v6615_v4  ;;  %v6682_v4 = vld [vmem:[#allocation10 + $0x49c] ss:$12 sps:$4 sm:$0xff]  }
 0x24b   : > { %5792 = vmatpush3.bf16.msra.mxu1 %v6619_v9  ;;  %4648 = vmatprep.subr.bf16.mxu0 %v6622_v10  ;;  %v6683_v9 = vld [vmem:[#allocation10 + $0x548] ss:$12 sps:$4 sm:$0xff]   ;;  %v6680_v10 = vld [vmem:[#allocation10 + $0x498] ss:$12 sps:$4 sm:$0xff]  }
 0x24c   : > { %5793 = vmatprep.subr.bf16.mxu1 %v6623_v12  ;;  %v6687_v12 = vld [vmem:[#allocation10 + $0x4b4] ss:$12 sps:$4 sm:$0xff]  }
 0x24e   : > { %4649 = vmatpush1.bf16.msra.mxu0 %v6620_v14  ;;  %v6685_v14 = vld [vmem:[#allocation10 + $0x4b0] ss:$12 sps:$4 sm:$0xff]  }
 0x24f   : > { %5794 = vmatpush3.bf16.msra.mxu1 %v6624_v15  ;;  %4650 = vmatprep.subr.bf16.mxu0 %v6627_v16  ;;  %v6689_v15 = vld [vmem:[#allocation10 + $0x4a0] ss:$12 sps:$4 sm:$0xff]  }
 0x250   : > { %5795 = vmatprep.subr.bf16.mxu1 %v6628_v17  ;;  %v6692_v16 = vld [vmem:[#allocation10 + $0x4cc] ss:$12 sps:$4 sm:$0xff]  }
 0x251   : > { %v6693_v17 = vld [vmem:[#allocation10 + $0x578] ss:$12 sps:$4 sm:$0xff]  }
 0x252   : > { %4651 = vmatpush1.bf16.msra.mxu0 %v6625_v18  ;;  %v6690_v18 = vld [vmem:[#allocation10 + $0x4c8] ss:$12 sps:$4 sm:$0xff]  }
 0x253   : > { %5796 = vmatpush3.bf16.msra.mxu1 %v6629_v19  ;;  %4652 = vmatprep.subr.bf16.mxu0 %v6632_v21  ;;  %v6694_v19 = vld [vmem:[#allocation10 + $0x4b8] ss:$12 sps:$4 sm:$0xff]  }
 0x254   : > { %5797 = vmatprep.subr.bf16.mxu1 %v6633_v24  ;;  %v6697_v21 = vld [vmem:[#allocation10 + $0x4e4] ss:$12 sps:$4 sm:$0xff]  }
 0x255   : > { %v6698_v24 = vld [vmem:[#allocation10 + $0x590] ss:$12 sps:$4 sm:$0xff]  }
 0x256   : > { %4653 = vmatpush1.bf16.msra.mxu0 %v6630_v25  ;;  %v6695_v25 = vld [vmem:[#allocation10 + $0x4e0] ss:$12 sps:$4 sm:$0xff]  }
 0x257   : > { %5798 = vmatpush3.bf16.msra.mxu1 %v6634_v26  ;;  %4654 = vmatprep.subr.bf16.mxu0 %v6637_v27  ;;  %v6699_v26 = vld [vmem:[#allocation10 + $0x4d0] ss:$12 sps:$4 sm:$0xff]  }
 0x258   : > { %5799 = vmatprep.subr.bf16.mxu1 %v6638_v37  ;;  %v6702_v27 = vld [vmem:[#allocation10 + $0x4fc] ss:$12 sps:$4 sm:$0xff]  }
 0x259   : > { %v6703_v37 = vld [vmem:[#allocation10 + $0x5a8] ss:$12 sps:$4 sm:$0xff]  }
 0x25a   : > { %4655 = vmatpush1.bf16.msra.mxu0 %v6635_v30  ;;  %v6700_v30 = vld [vmem:[#allocation10 + $0x4f8] ss:$12 sps:$4 sm:$0xff]  }
 0x25b   : > { %5800 = vmatpush3.bf16.msra.mxu1 %v6639_v31  ;;  %4656 = vmatprep.subr.bf16.mxu0 %v6642_v32  ;;  %v622_v31 = vsub.s32 7, %v7397_v42  ;;  %v6704_v32 = vld [vmem:[#allocation10 + $0x4e8] ss:$12 sps:$4 sm:$0xff]  }
 0x25c   : > { %5807 = vmatprep.subr.bf16.mxu1 %v6643_v33  ;;  %v6707_v33 = vld [vmem:[#allocation10 + $0x514] ss:$12 sps:$4 sm:$0xff]  }
 0x25e   : > { %4657 = vmatpush1.bf16.msra.mxu0 %v6640_v34  ;;  %4875 = vmatmul.mubr.bf16.vlgmr.msra.gmra.mrb[20].mxu1 %v7437_v53  ;;  %v6663_v53 = vld [vmem:[#allocation10 + $0x428] ss:$12 sps:$4 sm:$0xff]   ;;  %v618_v34 = vsub.s32 6, %v7397_v42  ;;  %v6821_v42 = vld [vmem:[#allocation10 + $0x780] ss:$12 sps:$4 sm:$0xff]  }
 0x25f   : > { %5808 = vmatpush3.bf16.msra.mxu1 %v6644_v35  ;;  %4914 = vmatprep.mubr.bf16.mxu1 %v7439_v55  ;;  %v6664_v55 = vld [vmem:[#allocation10 + $0x368] ss:$12 sps:$4 sm:$0xff]   ;;  %v6708_v35 = vld [vmem:[#allocation10 + $0x5c0] ss:$12 sps:$4 sm:$0xff]  }
 0x260   : > { %4658 = vmatprep.subr.bf16.mxu0 %v6647_v36  ;;  %5809 = vmatprep.subr.bf16.mxu1 %v6648_v38  ;;  %v7455_v36 = vld [vmem:[#allocation9 + $0x8] sm:$0xf] }
 0x261   : > { %v6705_v38 = vld [vmem:[#allocation10 + $0x510] ss:$12 sps:$4 sm:$0xff]  }
 0x262   : > { %4659 = vmatpush1.bf16.msra.mxu0 %v6645_v39  ;;  %v6870_v39 = vld [vmem:[#allocation9] sm:$0xff] }
 0x263   : > { %5810 = vmatpush3.bf16.msra.mxu1 %v6649_v40  ;;  %4660 = vmatprep.subr.bf16.mxu0 %v6652_v29  ;;  %v623_v40 = vrot.slane %v6870_v39, %v622_v31  ;;  %v6709_v29 = vld [vmem:[#allocation10 + $0x500] ss:$12 sps:$4 sm:$0xff]   ;;  %v627_v31 = vrot.slane %v7455_v36, %v7402_v47 }
 0x264   : > { %5811 = vmatprep.subr.bf16.mxu1 %v6653_v41  ;;  %v6712_v41 = vld [vmem:[#allocation10 + $0x52c] ss:$12 sps:$4 sm:$0xff]  }
 0x266   : > { %4661 = vmatpush1.bf16.msra.mxu0 %v6650_v43  ;;  %v619_v43 = vrot.slane %v6870_v39, %v618_v34  ;;  %v6754_v34 = vld [vmem:[#allocation10 + $0x698] ss:$12 sps:$4 sm:$0xff]   ;;  %v6758_v39 = vld [vmem:[#allocation10 + $0x770] ss:$12 sps:$4 sm:$0xff]  }
 0x267   : > { %5812 = vmatpush3.bf16.msra.mxu1 %v6654_v44  ;;  %4662 = vmatprep.subr.bf16.mxu0 %v6657_v45  ;;  %v6713_v45 = vld [vmem:[#allocation10 + $0x5d8] ss:$12 sps:$4 sm:$0xff]  }
 0x268   : > { %5813 = vmatprep.subr.bf16.mxu1 %v6658_v48  ;;  %v631_v48 = vrot.slane %v7455_v36, %v7405_v20 }
 0x26a   : > { %4663 = vmatpush1.bf16.msra.mxu0 %v6655_v49 }
 0x26b   : > { %5814 = vmatpush3.bf16.msra.mxu1 %v6659_v51  ;;  %4664 = vmatprep.subr.bf16.mxu0 %v6662_v52  ;;  %v6710_v52 = vld [vmem:[#allocation10 + $0x528] ss:$12 sps:$4 sm:$0xff]  }
 0x26c   : > { %5815 = vmatprep.subr.bf16.mxu1 %v6663_v53 }
 0x26e   : > { %4665 = vmatpush1.bf16.msra.mxu0 %v6660_v23  ;;  %v6714_v23 = vld [vmem:[#allocation10 + $0x518] ss:$12 sps:$4 sm:$0xff]  }
 0x26f   : > { %5816 = vmatpush3.bf16.msra.mxu1 %v6664_v55  ;;  %4666 = vmatprep.subr.bf16.mxu0 %v6667_v56 }
 0x270   : > { %5817 = vmatprep.subr.bf16.mxu1 %v6668_v57  ;;  %v5904_v57 = vadd.f32 %v7446_v8, %v631_v48  ;;  %v6785_v48 = vld [vmem:[#allocation10 + $0x788] ss:$12 sps:$4 sm:$0xff]  }
 0x272   : > { %4667 = vmatpush1.bf16.msra.mxu0 %v6665_v59  ;;  %v6718_v59 = vld [vmem:[#allocation10 + $0x5f0] ss:$12 sps:$4 sm:$0xff]  }
 0x273   : > { %5818 = vmatpush3.bf16.msra.mxu1 %v6669_v61  ;;  %4668 = vmatprep.subr.bf16.mxu0 %v6672_v58  ;;  %v6715_v61 = vld [vmem:[#allocation10 + $0x540] ss:$12 sps:$4 sm:$0xff]   ;;  %v6719_v58 = vld [vmem:[#allocation10 + $0x530] ss:$12 sps:$4 sm:$0xff]  }
 0x274   : > { %5819 = vmatprep.subr.bf16.mxu1 %v6673_v0  ;;  %v6722_v0 = vld [vmem:[#allocation10 + $0x55c] ss:$12 sps:$4 sm:$0xff]  }
 0x276   : > { %4669 = vmatpush1.bf16.msra.mxu0 %v6670_v62 }
 0x277   : > { %5820 = vmatpush3.bf16.msra.mxu1 %v6674_v46  ;;  %4679 = vmatprep.subr.bf16.mxu0 %v6677_v1  ;;  %v2604_v46 = vmax.f32 %v5904_v57, 0.0  ;;  %v6720_v1 = vld [vmem:[#allocation10 + $0x558] ss:$12 sps:$4 sm:$0xff]   ;;  %v6799_v57 = vld [vmem:[#allocation10 + $0x890] ss:$12 sps:$4 sm:$0xff]  }
 0x278   : > { %5821 = vmatprep.subr.bf16.mxu1 %v6678_v2  ;;  %v6724_v2 = vld [vmem:[#allocation10 + $0x608] ss:$12 sps:$4 sm:$0xff]  }
 0x279   : > { %4671 = vmatmul.mubr.bf16.vlgmr.msra.gmra.mrb[8].mxu0 %v2611_v6 }
 0x27a   : > { %4680 = vmatpush1.bf16.msra.mxu0 %v6675_v5  ;;  %v6727_v5 = vld [vmem:[#allocation10 + $0x574] ss:$12 sps:$4 sm:$0xff]  }
 0x27b   : > { %5822 = vmatpush3.bf16.msra.mxu1 %v6679_v22  ;;  %4681 = vmatprep.subr.bf16.mxu0 %v6682_v4  ;;  %v7462_v22 = vpack.c.bf16 %v2604_v46, %v2604_v46  ;;  %v6725_v4 = vld [vmem:[#allocation10 + $0x570] ss:$12 sps:$4 sm:$0xff]   ;;  %v6809_v46 = vld [vmem:[#allocation10 + $0x8c0] ss:$12 sps:$4 sm:$0xff]  }
 0x27c   : > { %5829 = vmatprep.subr.bf16.mxu1 %v6683_v9  ;;  %v6729_v9 = vld [vmem:[#allocation10 + $0x620] ss:$12 sps:$4 sm:$0xff]  }
 0x27e   : > { %4682 = vmatpush1.bf16.msra.mxu0 %v6680_v10  ;;  %4915 = vmatmul.mubr.bf16.vlgmr.msra.gmra.mrb[24].mxu1 %v2611_v6  ;;  %v6728_v6 = vld [vmem:[#allocation10 + $0x6e0] ss:$12 sps:$4 sm:$0xff]  }
 0x27f   : > { %5830 = vmatpush3.bf16.msra.mxu1 %v6684_v11  ;;  %4683 = vmatprep.subr.bf16.mxu0 %v6687_v12  ;;  %v6732_v10 = vld [vmem:[#allocation10 + $0x58c] ss:$12 sps:$4 sm:$0xff]   ;;  %v6730_v12 = vld [vmem:[#allocation10 + $0x588] ss:$12 sps:$4 sm:$0xff]  }
 0x280   : > { %5831 = vmatprep.subr.bf16.mxu1 %v6688_v13  ;;  %v6733_v11 = vld [vmem:[#allocation10 + $0x6f8] ss:$12 sps:$4 sm:$0xff]  }
 0x281   : > { %v6734_v13 = vld [vmem:[#allocation10 + $0x638] ss:$12 sps:$4 sm:$0xff]  }
 0x282   : > { %4684 = vmatpush1.bf16.msra.mxu0 %v6685_v14  ;;  %v6737_v14 = vld [vmem:[#allocation10 + $0x5a4] ss:$12 sps:$4 sm:$0xff]  }
 0x283   : > { %5832 = vmatpush3.bf16.msra.mxu1 %v6689_v15  ;;  %4685 = vmatprep.subr.bf16.mxu0 %v6692_v16  ;;  %v6738_v15 = vld [vmem:[#allocation10 + $0x710] ss:$12 sps:$4 sm:$0xff]   ;;  %v6735_v16 = vld [vmem:[#allocation10 + $0x5a0] ss:$12 sps:$4 sm:$0xff]  }
 0x284   : > { %5833 = vmatprep.subr.bf16.mxu1 %v6693_v17  ;;  %v6739_v17 = vld [vmem:[#allocation10 + $0x650] ss:$12 sps:$4 sm:$0xff]  }
 0x286   : > { %4686 = vmatpush1.bf16.msra.mxu0 %v6690_v18  ;;  %v6742_v18 = vld [vmem:[#allocation10 + $0x5bc] ss:$12 sps:$4 sm:$0xff]  }
 0x287   : > { %5834 = vmatpush3.bf16.msra.mxu1 %v6694_v19  ;;  %4687 = vmatprep.subr.bf16.mxu0 %v6697_v21  ;;  %v6743_v19 = vld [vmem:[#allocation10 + $0x728] ss:$12 sps:$4 sm:$0xff]   ;;  %v6740_v21 = vld [vmem:[#allocation10 + $0x5b8] ss:$12 sps:$4 sm:$0xff]  }
 0x288   : > { %5835 = vmatprep.subr.bf16.mxu1 %v6698_v24  ;;  %v6744_v24 = vld [vmem:[#allocation10 + $0x668] ss:$12 sps:$4 sm:$0xff]  }
 0x28a   : > { %4688 = vmatpush1.bf16.msra.mxu0 %v6695_v25  ;;  %v6747_v25 = vld [vmem:[#allocation10 + $0x5d4] ss:$12 sps:$4 sm:$0xff]  }
 0x28b   : > { %5836 = vmatpush3.bf16.msra.mxu1 %v6699_v26  ;;  %4689 = vmatprep.subr.bf16.mxu0 %v6702_v27  ;;  %v6748_v26 = vld [vmem:[#allocation10 + $0x740] ss:$12 sps:$4 sm:$0xff]   ;;  %v6745_v27 = vld [vmem:[#allocation10 + $0x5d0] ss:$12 sps:$4 sm:$0xff]  }
 0x28c   : > { %5837 = vmatprep.subr.bf16.mxu1 %v6703_v37  ;;  %v6749_v37 = vld [vmem:[#allocation10 + $0x680] ss:$12 sps:$4 sm:$0xff]  }
 0x28e   : > { %4690 = vmatpush1.bf16.msra.mxu0 %v6700_v30  ;;  %v6752_v30 = vld [vmem:[#allocation10 + $0x5ec] ss:$12 sps:$4 sm:$0xff]  }
 0x28f   : > { %5838 = vmatpush3.bf16.msra.mxu1 %v6704_v32  ;;  %4691 = vmatprep.subr.bf16.mxu0 %v6707_v33  ;;  %v6753_v32 = vld [vmem:[#allocation10 + $0x758] ss:$12 sps:$4 sm:$0xff]   ;;  %v6750_v33 = vld [vmem:[#allocation10 + $0x5e8] ss:$12 sps:$4 sm:$0xff]  }
 0x290   : > { %v2424_v44 = vpop.f32.mrb[8].mxu1  ;;  %5839 = vmatprep.subr.bf16.mxu1 %v6708_v35  ;;  %v6757_v35 = vld [vmem:[#allocation10 + $0x604] ss:$12 sps:$4 sm:$0xff]  }
 0x291   : > { %v2426_v49 = vpop.f32.mrb[9].mxu1  ;;  %v5901_v55 = vadd.f32 %v2424_v44, %v619_v43  ;;  %v6784_v44 = vld [vmem:[#allocation10 + $0x848] ss:$12 sps:$4 sm:$0xff]  }
 0x292   : > { %v5902_v50 = vadd.f32 %v2426_v49, %v623_v40  ;;  %4692 = vmatpush1.bf16.msra.mxu0 %v6705_v38  ;;  %v2428_v51 = vpop.f32.mrb[10].mxu1  ;;  %v5903_v38 = vadd.f32 %v7444_v7, %v627_v31  ;;  %v6755_v40 = vld [vmem:[#allocation10 + $0x600] ss:$12 sps:$4 sm:$0xff]  }
 0x293   : > { %5840 = vmatpush3.bf16.msra.mxu1 %v6709_v29  ;;  %v2429_v53 = vpop.f32.mrb[11].mxu1  ;;  %4693 = vmatprep.subr.bf16.mxu0 %v6712_v41  ;;  %v2601_v62 = vmax.f32 %v5901_v55, 0.0  ;;  %v6759_v29 = vld [vmem:[#allocation10 + $0x6b0] ss:$12 sps:$4 sm:$0xff]   ;;  %v6765_v7 = vld [vmem:[#allocation10 + $0x634] ss:$12 sps:$4 sm:$0xff]  }
 0x294   : > { %v2602_v56 = vmax.f32 %v5902_v50, 0.0  ;;  %5841 = vmatprep.subr.bf16.mxu1 %v6713_v45  ;;  %v6762_v41 = vld [vmem:[#allocation10 + $0x61c] ss:$12 sps:$4 sm:$0xff]   ;;  %v2603_v43 = vmax.f32 %v5903_v38, 0.0  ;;  %v6760_v45 = vld [vmem:[#allocation10 + $0x618] ss:$12 sps:$4 sm:$0xff]  }
 0x295   : > { %v7460_v8 = vpack.c.bf16 %v2601_v62, %v2601_v62  ;;  %v6789_v50 = vld [vmem:[#allocation10 + $0x860] ss:$12 sps:$4 sm:$0xff]   ;;  %v6763_v51 = vld [vmem:[#allocation10 + $0x630] ss:$12 sps:$4 sm:$0xff]  }
 0x296   : > { %v2614_v60 = vpack.c.bf16 %v2602_v56, %v2602_v56  ;;  %4694 = vmatpush1.bf16.msra.mxu0 %v6710_v52  ;;  %v7471_v49 = vpack.c.bf16 %v2603_v43, %v2603_v43  ;;  %v6768_v52 = vld [vmem:[#allocation10 + $0x64c] ss:$12 sps:$4 sm:$0xff]   ;;  %v6771_v55 = vld [vmem:[#allocation10 + $0x664] ss:$12 sps:$4 sm:$0xff]   ;;  %v6777_v62 = vld [vmem:[#allocation10 + $0x694] ss:$12 sps:$4 sm:$0xff]  }
 0x297   : > { %5842 = vmatpush3.bf16.msra.mxu1 %v6714_v23  ;;  %4695 = vmatprep.subr.bf16.mxu0 %v6717_v54  ;;  %v6790_v53 = vld [vmem:[#allocation10 + $0x7a0] ss:$12 sps:$4 sm:$0xff]   ;;  %v6794_v23 = vld [vmem:[#allocation10 + $0x878] ss:$12 sps:$4 sm:$0xff]   ;;  %v6766_v54 = vld [vmem:[#allocation10 + $0x648] ss:$12 sps:$4 sm:$0xff]  }
 0x298   : > { %4711 = vmatprep.mubr.bf16.mxu0 %v2614_v60  ;;  %4954 = vmatprep.mubr.bf16.mxu1 %v2614_v60  ;;  %v6795_v56 = vld [vmem:[#allocation10 + $0x7b8] ss:$12 sps:$4 sm:$0xff]   ;;  %v6774_v60 = vld [vmem:[#allocation10 + $0x67c] ss:$12 sps:$4 sm:$0xff]  }
 0x299   : > { %5843 = vmatprep.subr.bf16.mxu1 %v6718_v59  ;;  %v6769_v59 = vld [vmem:[#allocation10 + $0x660] ss:$12 sps:$4 sm:$0xff]  }
 0x29a   : > { %4696 = vmatpush1.bf16.msra.mxu0 %v6715_v61  ;;  %v6800_v61 = vld [vmem:[#allocation10 + $0x7d0] ss:$12 sps:$4 sm:$0xff]  }
 0x29b   : > { %5844 = vmatpush3.bf16.msra.mxu1 %v6719_v58  ;;  %4697 = vmatprep.subr.bf16.mxu0 %v6722_v0  ;;  %v6804_v58 = vld [vmem:[#allocation10 + $0x8a8] ss:$12 sps:$4 sm:$0xff]   ;;  %v6772_v0 = vld [vmem:[#allocation10 + $0x678] ss:$12 sps:$4 sm:$0xff]  }
 0x29c   : > { %5851 = vmatprep.subr.bf16.mxu1 %v6723_v63  ;;  %v6805_v63 = vld [vmem:[#allocation10 + $0x7e8] ss:$12 sps:$4 sm:$0xff]  }
 0x29e   : > { %4698 = vmatpush1.bf16.msra.mxu0 %v6720_v1  ;;  %4955 = vmatmul.mubr.bf16.vlgmr.msra.gmra.mrb[28].mxu1 %v7460_v8  ;;  %v6775_v1 = vld [vmem:[#allocation10 + $0x690] ss:$12 sps:$4 sm:$0xff]  }
 0x29f   : > { %5852 = vmatpush3.bf16.msra.mxu1 %v6724_v2  ;;  %4994 = vmatprep.mubr.bf16.mxu1 %v7462_v22  ;;  %v6780_v2 = vld [vmem:[#allocation10 + $0x6ac] ss:$12 sps:$4 sm:$0xff]  }
 0x2a0   : > { %4699 = vmatprep.subr.bf16.mxu0 %v6727_v5  ;;  %5853 = vmatprep.subr.bf16.mxu1 %v6728_v6  ;;  %v6814_v5 = vld [vmem:[#allocation10 + $0x8d8] ss:$12 sps:$4 sm:$0xff]   ;;  %v6778_v6 = vld [vmem:[#allocation10 + $0x6a8] ss:$12 sps:$4 sm:$0xff]  }
 0x2a2   : > { %4700 = vmatpush1.bf16.msra.mxu0 %v6725_v4  ;;  %v6815_v4 = vld [vmem:[#allocation10 + $0x818] ss:$12 sps:$4 sm:$0xff]  }
 0x2a3   : > { %5854 = vmatpush3.bf16.msra.mxu1 %v6729_v9  ;;  %4701 = vmatprep.subr.bf16.mxu0 %v6732_v10  ;;  %v6819_v9 = vld [vmem:[#allocation10 + $0x8f0] ss:$12 sps:$4 sm:$0xff]   ;;  %v6781_v10 = vld [vmem:[#allocation10 + $0x6c0] ss:$12 sps:$4 sm:$0xff]  }
 0x2a4   : > { %5855 = vmatprep.subr.bf16.mxu1 %v6733_v11  ;;  %v6788_v11 = vld [vmem:[#allocation10 + $0x6dc] ss:$12 sps:$4 sm:$0xff]  }
 0x2a6   : > { %4702 = vmatpush1.bf16.msra.mxu0 %v6730_v12  ;;  %v6820_v12 = vld [vmem:[#allocation10 + $0x830] ss:$12 sps:$4 sm:$0xff]  }
 0x2a7   : > { %5856 = vmatpush3.bf16.msra.mxu1 %v6734_v13  ;;  %4703 = vmatprep.subr.bf16.mxu0 %v6737_v14  ;;  %v6786_v13 = vld [vmem:[#allocation10 + $0x6d8] ss:$12 sps:$4 sm:$0xff]   ;;  %v6793_v14 = vld [vmem:[#allocation10 + $0x6f4] ss:$12 sps:$4 sm:$0xff]  }
 0x2a8   : > { %5857 = vmatprep.subr.bf16.mxu1 %v6738_v15  ;;  %v6791_v15 = vld [vmem:[#allocation10 + $0x6f0] ss:$12 sps:$4 sm:$0xff]  }
 0x2aa   : > { %4704 = vmatpush1.bf16.msra.mxu0 %v6735_v16  ;;  %v6798_v16 = vld [vmem:[#allocation10 + $0x70c] ss:$12 sps:$4 sm:$0xff]  }
 0x2ab   : > { %5858 = vmatpush3.bf16.msra.mxu1 %v6739_v17  ;;  %4705 = vmatprep.subr.bf16.mxu0 %v6742_v18  ;;  %v6796_v17 = vld [vmem:[#allocation10 + $0x708] ss:$12 sps:$4 sm:$0xff]   ;;  %v6803_v18 = vld [vmem:[#allocation10 + $0x724] ss:$12 sps:$4 sm:$0xff]  }
 0x2ac   : > { %5859 = vmatprep.subr.bf16.mxu1 %v6743_v19  ;;  %v6801_v19 = vld [vmem:[#allocation10 + $0x720] ss:$12 sps:$4 sm:$0xff]  }
 0x2ae   : > { %4706 = vmatpush1.bf16.msra.mxu0 %v6740_v21  ;;  %v6808_v21 = vld [vmem:[#allocation10 + $0x73c] ss:$12 sps:$4 sm:$0xff]  }
 0x2af   : > { %5860 = vmatpush3.bf16.msra.mxu1 %v6744_v24  ;;  %4707 = vmatprep.subr.bf16.mxu0 %v6747_v25  ;;  %v6806_v24 = vld [vmem:[#allocation10 + $0x738] ss:$12 sps:$4 sm:$0xff]   ;;  %v6813_v25 = vld [vmem:[#allocation10 + $0x754] ss:$12 sps:$4 sm:$0xff]  }
 0x2b0   : > { %5861 = vmatprep.subr.bf16.mxu1 %v6748_v26  ;;  %v635_v26 = vrot.slane %v7455_v36, %v7427_v28 }
 0x2b2   : > { %4708 = vmatpush1.bf16.msra.mxu0 %v6745_v27  ;;  %v6811_v27 = vld [vmem:[#allocation10 + $0x750] ss:$12 sps:$4 sm:$0xff]  }
 0x2b3   : > { %5862 = vmatpush3.bf16.msra.mxu1 %v6749_v37  ;;  %4709 = vmatprep.subr.bf16.mxu0 %v6752_v30  ;;  %v639_v37 = vrot.slane %v7455_v36, %v606_v3  ;;  %v6818_v30 = vld [vmem:[#allocation10 + $0x76c] ss:$12 sps:$4 sm:$0xff]   ;;  %v6826_v3 = vld [vmem:[#allocation10 + $0x79c] ss:$12 sps:$4 sm:$0xff]  }
 0x2b4   : > { %5863 = vmatprep.subr.bf16.mxu1 %v6753_v32  ;;  %v6824_v36 = vld [vmem:[#allocation10 + $0x798] ss:$12 sps:$4 sm:$0xff]  }
 0x2b6   : > { %4710 = vmatpush1.bf16.msra.mxu0 %v6750_v33 }
 0x2b7   : > { %5864 = vmatpush3.bf16.msra.mxu1 %v6754_v34  ;;  %4720 = vmatprep.subr.bf16.mxu0 %v6757_v35  ;;  %v6816_v35 = vld [vmem:[#allocation10 + $0x768] ss:$12 sps:$4 sm:$0xff]  }
 0x2b8   : > { %5865 = vmatprep.subr.bf16.mxu1 %v6758_v39 }
 0x2b9   : > { %4712 = vmatmul.mubr.bf16.vlgmr.msra.gmra.mrb[8].mxu0 %v7460_v8  ;;  %v6810_v8 = vld [vmem:[#allocation10 + $0x800] ss:$12 sps:$4 sm:$0xff]  }
 0x2ba   : > { %4721 = vmatpush1.bf16.msra.mxu0 %v6755_v40  ;;  %4752 = vmatprep.mubr.bf16.mxu0 %v7462_v22  ;;  %v6783_v22 = vld [vmem:[#allocation10 + $0x6c4] ss:$12 sps:$4 sm:$0xff]  }
 0x2bb   : > { %5866 = vmatpush3.bf16.msra.mxu1 %v6759_v29  ;;  %4722 = vmatprep.subr.bf16.mxu0 %v6762_v41  ;;  %v6823_v40 = vld [vmem:[#allocation10 + $0x784] ss:$12 sps:$4 sm:$0xff]  }
 0x2bc   : > { %5873 = vmatprep.subr.bf16.mxu1 %v6784_v44 }
 0x2be   : > { %4723 = vmatpush1.bf16.msra.mxu0 %v6760_v45  ;;  %4995 = vmatmul.mubr.bf16.vlgmr.msra.gmra.mrb[32].mxu1 %v7471_v49  ;;  %v6829_v45 = vld [vmem:[#allocation10 + $0x7b4] ss:$12 sps:$4 sm:$0xff]  }
 0x2bf   : > { %4724 = vmatprep.subr.bf16.mxu0 %v6765_v7  ;;  %5874 = vmatpush3.bf16.msra.mxu1 %v6785_v48  ;;  %v6827_v7 = vld [vmem:[#allocation10 + $0x7b0] ss:$12 sps:$4 sm:$0xff]   ;;  %v6832_v48 = vld [vmem:[#allocation10 + $0x7cc] ss:$12 sps:$4 sm:$0xff]  }
 0x2c0   : > { %5875 = vmatprep.subr.bf16.mxu1 %v6789_v50  ;;  %v6830_v50 = vld [vmem:[#allocation10 + $0x7c8] ss:$12 sps:$4 sm:$0xff]  }
 0x2c2   : > { %4725 = vmatpush1.bf16.msra.mxu0 %v6763_v51  ;;  %v6835_v51 = vld [vmem:[#allocation10 + $0x7e4] ss:$12 sps:$4 sm:$0xff]  }
 0x2c3   : > { %4726 = vmatprep.subr.bf16.mxu0 %v6768_v52  ;;  %5876 = vmatpush3.bf16.msra.mxu1 %v6790_v53  ;;  %v6833_v52 = vld [vmem:[#allocation10 + $0x7e0] ss:$12 sps:$4 sm:$0xff]   ;;  %v6838_v53 = vld [vmem:[#allocation10 + $0x7fc] ss:$12 sps:$4 sm:$0xff]  }
 0x2c4   : > { %5877 = vmatprep.subr.bf16.mxu1 %v6794_v23  ;;  %v6841_v23 = vld [vmem:[#allocation10 + $0x814] ss:$12 sps:$4 sm:$0xff]  }
 0x2c6   : > { %4727 = vmatpush1.bf16.msra.mxu0 %v6766_v54  ;;  %v6839_v54 = vld [vmem:[#allocation10 + $0x810] ss:$12 sps:$4 sm:$0xff]  }
 0x2c7   : > { %4728 = vmatprep.subr.bf16.mxu0 %v6771_v55  ;;  %5878 = vmatpush3.bf16.msra.mxu1 %v6795_v56  ;;  %v6844_v55 = vld [vmem:[#allocation10 + $0x82c] ss:$12 sps:$4 sm:$0xff]  }
 0x2c8   : > { %5879 = vmatprep.subr.bf16.mxu1 %v6799_v57 }
 0x2ca   : > { %4729 = vmatpush1.bf16.msra.mxu0 %v6769_v59  ;;  %v6842_v59 = vld [vmem:[#allocation10 + $0x828] ss:$12 sps:$4 sm:$0xff]  }
 0x2cb   : > { %4730 = vmatprep.subr.bf16.mxu0 %v6774_v60  ;;  %5880 = vmatpush3.bf16.msra.mxu1 %v6800_v61 }
 0x2cc   : > { %5881 = vmatprep.subr.bf16.mxu1 %v6804_v58  ;;  %v6847_v58 = vld [vmem:[#allocation10 + $0x844] ss:$12 sps:$4 sm:$0xff]  }
 0x2ce   : > { %4731 = vmatpush1.bf16.msra.mxu0 %v6772_v0 }
 0x2cf   : > { %4732 = vmatprep.subr.bf16.mxu0 %v6777_v62  ;;  %5882 = vmatpush3.bf16.msra.mxu1 %v6805_v63  ;;  %v6845_v62 = vld [vmem:[#allocation10 + $0x840] ss:$12 sps:$4 sm:$0xff]   ;;  %v6850_v63 = vld [vmem:[#allocation10 + $0x85c] ss:$12 sps:$4 sm:$0xff]  }
 0x2d0   : > { %5883 = vmatprep.subr.bf16.mxu1 %v6809_v46  ;;  %v6848_v46 = vld [vmem:[#allocation10 + $0x858] ss:$12 sps:$4 sm:$0xff]  }
 0x2d2   : > { %4733 = vmatpush1.bf16.msra.mxu0 %v6775_v1  ;;  %v6853_v1 = vld [vmem:[#allocation10 + $0x874] ss:$12 sps:$4 sm:$0xff]  }
 0x2d3   : > { %4734 = vmatprep.subr.bf16.mxu0 %v6780_v2  ;;  %5884 = vmatpush3.bf16.msra.mxu1 %v6810_v8  ;;  %v6851_v2 = vld [vmem:[#allocation10 + $0x870] ss:$12 sps:$4 sm:$0xff]   ;;  %v6856_v8 = vld [vmem:[#allocation10 + $0x88c] ss:$12 sps:$4 sm:$0xff]  }
 0x2d4   : > { %5885 = vmatprep.subr.bf16.mxu1 %v6814_v5  ;;  %v6854_v5 = vld [vmem:[#allocation10 + $0x888] ss:$12 sps:$4 sm:$0xff]  }
 0x2d6   : > { %4735 = vmatpush1.bf16.msra.mxu0 %v6778_v6  ;;  %v6859_v6 = vld [vmem:[#allocation10 + $0x8a4] ss:$12 sps:$4 sm:$0xff]  }
 0x2d7   : > { %4736 = vmatprep.subr.bf16.mxu0 %v6783_v22  ;;  %5886 = vmatpush3.bf16.msra.mxu1 %v6815_v4  ;;  %v6857_v22 = vld [vmem:[#allocation10 + $0x8a0] ss:$12 sps:$4 sm:$0xff]   ;;  %v6862_v4 = vld [vmem:[#allocation10 + $0x8bc] ss:$12 sps:$4 sm:$0xff]  }
 0x2d8   : > { %5887 = vmatprep.subr.bf16.mxu1 %v6819_v9  ;;  %v6860_v9 = vld [vmem:[#allocation10 + $0x8b8] ss:$12 sps:$4 sm:$0xff]  }
 0x2da   : > { %4737 = vmatpush1.bf16.msra.mxu0 %v6781_v10  ;;  %v6865_v10 = vld [vmem:[#allocation10 + $0x8d4] ss:$12 sps:$4 sm:$0xff]  }
 0x2db   : > { %4738 = vmatprep.subr.bf16.mxu0 %v6788_v11  ;;  %5888 = vmatpush3.bf16.msra.mxu1 %v6820_v12  ;;  %v3003_v11 = vld [vmem:[#allocation12] sm:$0x7]  ;;  %v6863_v12 = vld [vmem:[#allocation10 + $0x8d0] ss:$12 sps:$4 sm:$0xff]  }
 0x2de   : > { %4739 = vmatpush1.bf16.msra.mxu0 %v6786_v13  ;;  %v3016_v13 = vrot.slane %v3003_v11, %v7427_v28 }
 0x2df   : > { %4740 = vmatprep.subr.bf16.mxu0 %v6793_v14  ;;  %v6868_v14 = vld [vmem:[#allocation10 + $0x8ec] ss:$12 sps:$4 sm:$0xff]  }
 0x2e2   : > { %4741 = vmatpush1.bf16.msra.mxu0 %v6791_v15 }
 0x2e3   : > { %4742 = vmatprep.subr.bf16.mxu0 %v6798_v16 }
 0x2e6   : > { %4743 = vmatpush1.bf16.msra.mxu0 %v6796_v17  ;;  %v6866_v17 = vld [vmem:[#allocation10 + $0x8e8] ss:$12 sps:$4 sm:$0xff]  }
 0x2e7   : > { %4744 = vmatprep.subr.bf16.mxu0 %v6803_v18 }
 0x2ea   : > { %4745 = vmatpush1.bf16.msra.mxu0 %v6801_v19 }
 0x2eb   : > { %4746 = vmatprep.subr.bf16.mxu0 %v6808_v21 }
 0x2ee   : > { %4747 = vmatpush1.bf16.msra.mxu0 %v6806_v24 }
 0x2ef   : > { %4748 = vmatprep.subr.bf16.mxu0 %v6813_v25 }
 0x2f0   : > { %v2588_v31 = vpop.f32.mrb[12].mxu1 }
 0x2f1   : > { %v5905_v32 = vadd.f32 %v2588_v31, %v635_v26  ;;  %v2590_v33 = vpop.f32.mrb[13].mxu1 }
 0x2f2   : > { %v5906_v34 = vadd.f32 %v2590_v33, %v639_v37  ;;  %4749 = vmatpush1.bf16.msra.mxu0 %v6811_v27  ;;  %v2592_v38 = vpop.f32.mrb[14].mxu1 }
 0x2f3   : > { %v2605_v39 = vmax.f32 %v5905_v32, 0.0  ;;  %4750 = vmatprep.subr.bf16.mxu0 %v6818_v30  ;;  %v2593_v29 = vpop.f32.mrb[15].mxu1 }
 0x2f4   : > { %v2606_v41 = vmax.f32 %v5906_v34, 0.0 }
 0x2f5   : > { %v7479_v43 = vpack.c.bf16 %v2605_v39, %v2605_v39 }
 0x2f6   : > { %v2618_v44 = vpack.c.bf16 %v2606_v41, %v2606_v41  ;;  %4751 = vmatpush1.bf16.msra.mxu0 %v6816_v35 }
 0x2f7   : > { %4761 = vmatprep.subr.bf16.mxu0 %v6823_v40 }
 0x2f8   : > { %5034 = vmatprep.mubr.bf16.mxu1 %v2618_v44 }
 0x2f9   : > { %4753 = vmatmul.mubr.bf16.vlgmr.msra.gmra.mrb[8].mxu0 %v7471_v49  ;;  %5035 = vmatmul.mubr.bf16.vlgmr.msra.gmra.mrb[36].mxu1 %v7479_v43  ;;  %v6836_v49 = vld [vmem:[#allocation10 + $0x7f8] ss:$12 sps:$4 sm:$0xff]  }
 0x2fa   : > { %4762 = vmatpush1.bf16.msra.mxu0 %v6821_v42  ;;  %4793 = vmatprep.mubr.bf16.mxu0 %v2618_v44 }
 0x2fb   : > { %4763 = vmatprep.subr.bf16.mxu0 %v6826_v3 }
 0x2fe   : > { %4764 = vmatpush1.bf16.msra.mxu0 %v6824_v36 }
 0x2ff   : > { %4765 = vmatprep.subr.bf16.mxu0 %v6829_v45 }
 0x302   : > { %4766 = vmatpush1.bf16.msra.mxu0 %v6827_v7 }
 0x303   : > { %4767 = vmatprep.subr.bf16.mxu0 %v6832_v48 }
 0x306   : > { %4768 = vmatpush1.bf16.msra.mxu0 %v6830_v50 }
 0x307   : > { %4769 = vmatprep.subr.bf16.mxu0 %v6835_v51  ;;  %v3008_v51 = vrot.slane %v3003_v11, %v7402_v47 }
 0x30a   : > { %4770 = vmatpush1.bf16.msra.mxu0 %v6833_v52  ;;  %v3012_v52 = vrot.slane %v3003_v11, %v7405_v20 }
 0x30b   : > { %4771 = vmatprep.subr.bf16.mxu0 %v6838_v53 }
 0x30e   : > { %4772 = vmatpush1.bf16.msra.mxu0 %v6836_v49 }
 0x30f   : > { %4773 = vmatprep.subr.bf16.mxu0 %v6841_v23 }
 0x311   : > { %v5779_v56 = vpop.f32.mrb[16].mxu1 }
 0x312   : > { %4774 = vmatpush1.bf16.msra.mxu0 %v6839_v54  ;;  %v5780_v57 = vpop.f32.mrb[17].mxu1 }
 0x313   : > { %v5781_v60 = vadd.f32 %v5780_v57, %v5779_v56  ;;  %v5782_v61 = vpop.f32.mrb[18].mxu1  ;;  %4775 = vmatprep.subr.bf16.mxu0 %v6844_v55 }
 0x314   : > { %v5783_v0 = vpop.f32.mrb[19].mxu1 }
 0x315   : > { %v4837_v18 = vadd.f32 %v5781_v60, %v3016_v13 }
 0x316   : > { %4776 = vmatpush1.bf16.msra.mxu0 %v6842_v59 }
 0x317   : > { %4777 = vmatprep.subr.bf16.mxu0 %v6847_v58 }
 0x31a   : > { %4778 = vmatpush1.bf16.msra.mxu0 %v6845_v62 }
 0x31b   : > { %4779 = vmatprep.subr.bf16.mxu0 %v6850_v63 }
 0x31e   : > { %4780 = vmatpush1.bf16.msra.mxu0 %v6848_v46 }
 0x31f   : > { %4781 = vmatprep.subr.bf16.mxu0 %v6853_v1 }
 0x322   : > { %4782 = vmatpush1.bf16.msra.mxu0 %v6851_v2 }
 0x323   : > { %4783 = vmatprep.subr.bf16.mxu0 %v6856_v8 }
 0x326   : > { %4784 = vmatpush1.bf16.msra.mxu0 %v6854_v5 }
 0x327   : > { %4785 = vmatprep.subr.bf16.mxu0 %v6859_v6 }
 0x32a   : > { %4786 = vmatpush1.bf16.msra.mxu0 %v6857_v22 }
 0x32b   : > { %4787 = vmatprep.subr.bf16.mxu0 %v6862_v4 }
 0x32e   : > { %4788 = vmatpush1.bf16.msra.mxu0 %v6860_v9 }
 0x32f   : > { %4789 = vmatprep.subr.bf16.mxu0 %v6865_v10 }
 0x331   : > { %v5801_v15 = vpop.f32.mrb[20].mxu1 }
 0x332   : > { %4790 = vmatpush1.bf16.msra.mxu0 %v6863_v12  ;;  %v5802_v16 = vpop.f32.mrb[21].mxu1 }
 0x333   : > { %v5803_v19 = vadd.f32 %v5802_v16, %v5801_v15  ;;  %v5804_v21 = vpop.f32.mrb[22].mxu1  ;;  %4791 = vmatprep.subr.bf16.mxu0 %v6868_v14 }
 0x334   : > { %v5805_v24 = vpop.f32.mrb[23].mxu1 }
 0x335   : > { %v4877_v25 = vadd.f32 %v5803_v19, %v4837_v18 }
 0x336   : > { %4792 = vmatpush1.bf16.msra.mxu0 %v6866_v17 }
 0x339   : > { %4794 = vmatmul.mubr.bf16.vlgmr.msra.gmra.mrb[8].mxu0 %v7479_v43 }
 0x351   : > { %v5823_v26 = vpop.f32.mrb[24].mxu1 }
 0x352   : > { %v5824_v27 = vpop.f32.mrb[25].mxu1 }
 0x353   : > { %v5825_v37 = vadd.f32 %v5824_v27, %v5823_v26  ;;  %v5826_v28 = vpop.f32.mrb[26].mxu1 }
 0x354   : > { %v5827_v30 = vpop.f32.mrb[27].mxu1 }
 0x355   : > { %v4917_v31 = vadd.f32 %v5825_v37, %v4877_v25 }
 0x371   : > { %v5845_v32 = vpop.f32.mrb[28].mxu1 }
 0x372   : > { %v5846_v33 = vpop.f32.mrb[29].mxu1 }
 0x373   : > { %v5847_v34 = vadd.f32 %v5846_v33, %v5845_v32  ;;  %v5848_v35 = vpop.f32.mrb[30].mxu1 }
 0x374   : > { %v5849_v38 = vpop.f32.mrb[31].mxu1 }
 0x375   : > { %v4957_v39 = vadd.f32 %v5847_v34, %v4917_v31 }
 0x391   : > { %v5867_v40 = vpop.f32.mrb[32].mxu1 }
 0x392   : > { %v5868_v29 = vpop.f32.mrb[33].mxu1 }
 0x393   : > { %v5869_v41 = vadd.f32 %v5868_v29, %v5867_v40  ;;  %v5870_v44 = vpop.f32.mrb[34].mxu1 }
 0x394   : > { %v5871_v42 = vpop.f32.mrb[35].mxu1 }
 0x395   : > { %v4997_v43 = vadd.f32 %v5869_v41, %v4957_v39 }
 0x3cc   : > { %v5889_v3 = vpop.f32.mrb[36].mxu1 }
 0x3cd   : > { %v5890_v36 = vpop.f32.mrb[37].mxu1 }
 0x3ce   : > { %v5891_v45 = vadd.f32 %v5890_v36, %v5889_v3  ;;  %v5892_v7 = vpop.f32.mrb[38].mxu1 }
 0x3cf   : > { %v5893_v48 = vpop.f32.mrb[39].mxu1 }
 0x3d0   : > { %v5037_v50 = vadd.f32 %v5891_v45, %v4997_v43 }
 0x3d2   : > { %5044 = vst [vmem:[%s296_s12 + $0x10] sm:$0xff] %v5037_v50 }
 0x40c   : > { %v4795_v53 = vpop.f32.mrb[8].mxu0 }
 0x40d   : > { %v5907_v49 = vadd.f32 %v4795_v53, %v3008_v51  ;;  %v4797_v23 = vpop.f32.mrb[9].mxu0 }
 0x40e   : > { %v5908_v54 = vadd.f32 %v4797_v23, %v3012_v52  ;;  %v4799_v55 = vpop.f32.mrb[10].mxu0 }
 0x40f   : > { %5042 = vst [vmem:[%s296_s12] sm:$0xff] %v5907_v49  ;;  %v4800_v47 = vpop.f32.mrb[11].mxu0 }
 0x410   : > { %5043 = vst [vmem:[%s296_s12 + $0x8] sm:$0xff] %v5908_v54 }
 0x411   : > { %7026 = shalt.err (!%p7023_p12)
}
 0x412   : > { %s7027_s8 = scalar_lea.hbm %s7492_s17, 384  ;;  %s7031_s10 = scalar_lea.hbm %s7542_s6, 768 }
 0x413   : > { %p7028_p13 = scmp.ne.s32.totalorder %s7492_s17, %s7027_s8  ;;  %p7032_p9 = scmp.lt.u32.totalorder %s7492_s17, %s7542_s6 }
 0x414   : > { %p7033_p4 = scmp.lt.u32.totalorder %s7031_s10, %s7027_s8  ;;  %p7035_p0 = scmp.lt.u32.totalorder %s7027_s8, %s7492_s17 }
 0x415   : > { %p7029_p1 = pnand %p7028_p13, %p7559_p6 }
 0x416   : > { %p7034_p8 = por %p7033_p4, %p7032_p9 }
 0x417   : > { %p7030_p7 = pneg %p7029_p1 }
 0x418   : > { %p7036_p2 = por %p7035_p0, %p7034_p8 }
 0x41a   : > { %p7037_p5 = pnand %p7036_p2, %p7030_p7 }
 0x41c   : > { %7040 = shalt.err (!%p7037_p5)
}
 0x41d   : > { %5976 = dma.vmem_to_hbm [thread:$0]  (%p7559_p6), %s7494_s24, 384, %s7492_s17, %s5046_s26  }
 0x41e PF: > { %s5072_s12 = sand.u32 1, %s7075_s0   ;;  %p7560_p10 = scmp.ne.s32.totalorder %s7552_s15, 0 }
 0x41f   : > { %p7561_p11 = scmp.ge.s32.totalorder %s7087_s23, 2  ;;  %s5073_s18 = scalar_lea.sflag [#allocation6], %s5072_s12 }
 0x421   : > { %p5996_p3 = pnand %p7561_p11, %p7560_p10 }
 0x423   : > { %7070 = dma.done.wait (!%p5996_p3), %s5073_s18, 384  }
 0x424   : > { %7072 = vsyncadd (!%p5996_p3), %s5073_s18, 4294966912  ;;  %p22_p12 = scmp.ge.s32.totalorder %s7271_s30, 4   ;;  %s7562_s0 = smov %s7079_s21 }
 0x425   : > { %s7563_s21 = smov %s7083_s22  ;;  %s7564_s22 = smov %s7282_s29 }
 0x426   : > { %s7565_s23 = smov %s7271_s30  ;;  %24 = sbr.rel (!%p22_p12) target bundleno = 7 (0x7), region = 101 }
 0x42d   :  { %5078 = vsyncpa [#allocation5], 1 }
 0x42e   :  { %5080 = vsyncpa [#allocation5 + $0x1], 1 }
 0x42f   :  { %5081 = vsyncpa [#allocation8], 1 }
 0x430   :  { %5082 = vsyncpa [#allocation11], 1 }
 0x431   :  { %5083 = vsyncpa [#allocation6], 1 }
 0x432   :  { %5085 = vsyncpa [#allocation6 + $0x1], 1 }

</bundles_post_ra>
